<compile_context>
chip_gen: v5e
topology: v5e:2x2
jax: 0.10.0
libtpu: 0.0.40
codegen_flags: <defaults>
</compile_context>

<pallas_src>
import functools

import jax
import jax.numpy as jnp
from jax.experimental import pallas as pl
from jax.experimental.pallas import tpu as pltpu

NUM_BITS = 8
QMIN = 0.0
QMAX = 2.0 ** NUM_BITS - 1.0  # 255.0


def _round_up(a, b):
    return (a + b - 1) // b * b


# ----------------------------- Qparam math (scalar glue) -----------------------------

def _calc_scale_zp(rmin, rmax):
    # Qparam.calcScaleZeroPoint (unsigned, num_bits=8).
    scale = (rmax - rmin) / (QMAX - QMIN)
    # Guard degenerate all-zero tensors (rmin == rmax == 0) against inf/NaN.
    scale = jnp.maximum(scale, 1e-8)
    zp = jnp.round(jnp.clip(QMAX - rmax / scale, QMIN, QMAX))
    return scale, zp


def _qparams_from_tensor(t):
    # Qparam.update: rmax = max(0, t.max()); rmin = min(0, t.min())
    rmax = jnp.maximum(jnp.max(t), 0.0)
    rmin = jnp.minimum(jnp.min(t), 0.0)
    return _calc_scale_zp(rmin, rmax)


def _fq_ref(x, s, z):
    # FakeQuantize forward: quantize (clamp then round) + dequantize.
    # Uses reciprocal multiply to match the kernel math exactly.
    q = jnp.round(jnp.clip(x * (1.0 / s) + z, QMIN, QMAX))
    return s * (q - z)


# ----------------------------- Pallas kernels -----------------------------

def _fq_codes_kernel(q_ref, x_ref, out_ref):
    """Elementwise fake-quant -> integer codes (q - z), emitted as bf16 (exact).

    q_ref: SMEM f32[2] = [1/scale, zero_point]
    """
    inv_s = q_ref[0]
    z = q_ref[1]
    q = jnp.round(jnp.clip(x_ref[...] * inv_s + z, QMIN, QMAX))
    out_ref[...] = (q - z).astype(jnp.bfloat16)   # integers in [-255, 255]: exact in bf16


def _qconv_matmul_kernel(scale_ref, xq_ref, wq_ref, bias_ref,
                         y_ref, ymin_ref, ymax_ref, *, p_real, tile_p):
    """bf16-code MXU matmul tile + post-scale + bias, with per-tile y min/max stats.

    scale_ref: SMEM f32[1] = [si * sw]
    xq_ref:    VMEM bf16[TP, K_pad]   (im2col patches as integer codes q_x - z_x)
    wq_ref:    VMEM bf16[K_pad, TO]   (weight matrix as integer codes q_w - z_w)
    bias_ref:  VMEM f32[1, TO]
    y_ref:     VMEM f32[TP, TO]
    ymin_ref/ymax_ref: VMEM f32[1, 1, 8, 128]  (tile-level stats, broadcast)
    """
    acc = jnp.dot(xq_ref[...], wq_ref[...], preferred_element_type=jnp.float32)
    y = acc * scale_ref[0] + bias_ref[...]
    y_ref[...] = y

    # Mask padded P rows out of the stats (they hold bare bias values).
    rows = pl.program_id(0) * tile_p + jax.lax.broadcasted_iota(jnp.int32, y.shape, 0)
    valid = rows < p_real
    tmin = jnp.min(jnp.where(valid, y, jnp.inf))
    tmax = jnp.max(jnp.where(valid, y, -jnp.inf))
    ymin_ref[...] = jnp.full(ymin_ref.shape, tmin, jnp.float32)
    ymax_ref[...] = jnp.full(ymax_ref.shape, tmax, jnp.float32)


def _fq_out_kernel(qo_ref, y_ref, out_ref, *, o_real):
    """Output fake-quant fused with the (P, O) -> (N, O, H*W) relayout.

    qo_ref:  SMEM f32[3] = [1/so, so, zo]
    y_ref:   VMEM f32[HWo, O_pad]   (rows of y for one image n)
    out_ref: VMEM f32[1, O, HWo]
    """
    inv_s = qo_ref[0]
    s = qo_ref[1]
    z = qo_ref[2]
    y = y_ref[...]
    fq = s * (jnp.round(jnp.clip(y * inv_s + z, QMIN, QMAX)) - z)   # (HWo, O_pad)
    out_ref[0] = fq.T[:o_real, :]                                   # (O, HWo)


# ----------------------------- wrapper -----------------------------

def qconv2d_forward(x, weight, bias, *, stride=1, padding=1, tile_p=256):
    """QConv2d.forward for a single call (training-mode fake-quant path). NCHW in/out."""
    N, C, H, W = x.shape
    O, _, KH, KW = weight.shape
    Hout = (H + 2 * padding - KH) // stride + 1
    Wout = (W + 2 * padding - KW) // stride + 1
    HWo = Hout * Wout
    P = N * HWo
    K = C * KH * KW

    # Lane-dense padding / tile plan (sized well under v7x's 64 MiB VMEM).
    K_pad = _round_up(K, 128)
    O_pad = _round_up(O, 128)
    TO = 256 if O_pad % 256 == 0 else 128
    TP = _round_up(min(tile_p, _round_up(P, 8)), 8)
    P_pad = _round_up(P, TP)
    grid_p = P_pad // TP
    grid_o = O_pad // TO

    x = x.astype(jnp.float32)
    weight = weight.astype(jnp.float32)
    bias = bias.astype(jnp.float32)

    # qi.update(x) / qw.update(weight): tiny global min/max reductions kept in JAX glue.
    si, zi = _qparams_from_tensor(x)
    sw, zw = _qparams_from_tensor(weight)

    # ---- prep kernel A: fake-quant x once on the raw input -> bf16 codes ----
    xi_params = jnp.stack([1.0 / si, zi]).astype(jnp.float32)
    x_codes = pl.pallas_call(
        _fq_codes_kernel,
        out_shape=jax.ShapeDtypeStruct((N, C, H, W), jnp.bfloat16),
        grid=(N,),
        in_specs=[
            pl.BlockSpec(memory_space=pltpu.MemorySpace.SMEM),
            pl.BlockSpec((1, C, H, W), lambda n: (n, 0, 0, 0)),
        ],
        out_specs=pl.BlockSpec((1, C, H, W), lambda n: (n, 0, 0, 0)),
        compiler_params=pltpu.CompilerParams(dimension_semantics=("parallel",)),
    )(xi_params, x)

    # ---- prep kernel B: fake-quant W once, laid out as lane-dense (K_pad, O_pad) codes ----
    wmat = jnp.pad(weight.reshape(O, K).T, ((0, K_pad - K), (0, O_pad - O)))  # (K_pad, O_pad)
    wi_params = jnp.stack([1.0 / sw, zw]).astype(jnp.float32)
    w_codes = pl.pallas_call(
        _fq_codes_kernel,
        out_shape=jax.ShapeDtypeStruct((K_pad, O_pad), jnp.bfloat16),
        in_specs=[
            pl.BlockSpec(memory_space=pltpu.MemorySpace.SMEM),
            pl.BlockSpec(memory_space=pltpu.MemorySpace.VMEM),
        ],
        out_specs=pl.BlockSpec(memory_space=pltpu.MemorySpace.VMEM),
    )(wi_params, wmat)

    # ---- im2col on the bf16 codes (layout plumbing; zero pad == code 0 == fq value 0). ----
    xp = jnp.pad(x_codes, ((0, 0), (0, 0), (padding, padding), (padding, padding)))
    cols = []
    for kh in range(KH):
        for kw in range(KW):
            cols.append(
                xp[:, :, kh:kh + stride * Hout:stride, kw:kw + stride * Wout:stride])
    # (KH*KW, N, C, Hout, Wout) -> (N, Hout, Wout, C, KH*KW) -> (P, K)
    patches = jnp.stack(cols, axis=0).transpose(1, 3, 4, 2, 0).reshape(P, K)
    patches = jnp.pad(patches, ((0, P_pad - P), (0, K_pad - K)))          # bf16 codes

    bias_pad = jnp.pad(bias, (0, O_pad - O)).reshape(1, O_pad)
    sisw = jnp.stack([si * sw]).astype(jnp.float32)

    # ---- kernel 1: tiled bf16 MXU matmul + scale + bias + per-tile y stats ----
    kernel1 = functools.partial(_qconv_matmul_kernel, p_real=P, tile_p=TP)
    y, ymin_t, ymax_t = pl.pallas_call(
        kernel1,
        out_shape=(
            jax.ShapeDtypeStruct((P_pad, O_pad), jnp.float32),
            jax.ShapeDtypeStruct((grid_p, grid_o, 8, 128), jnp.float32),
            jax.ShapeDtypeStruct((grid_p, grid_o, 8, 128), jnp.float32),
        ),
        grid=(grid_p, grid_o),
        in_specs=[
            pl.BlockSpec(memory_space=pltpu.MemorySpace.SMEM),      # si*sw
            pl.BlockSpec((TP, K_pad), lambda i, j: (i, 0)),         # patch codes
            pl.BlockSpec((K_pad, TO), lambda i, j: (0, j)),         # weight codes (resident over P)
            pl.BlockSpec((1, TO), lambda i, j: (0, j)),             # bias (resident over P)
        ],
        out_specs=(
            pl.BlockSpec((TP, TO), lambda i, j: (i, j)),
            pl.BlockSpec((1, 1, 8, 128), lambda i, j: (i, j, 0, 0)),
            pl.BlockSpec((1, 1, 8, 128), lambda i, j: (i, j, 0, 0)),
        ),
        compiler_params=pltpu.CompilerParams(
            dimension_semantics=("parallel", "parallel"),
            vmem_limit_bytes=64 * 1024 * 1024,
        ),
        cost_estimate=pl.CostEstimate(
            flops=2 * P_pad * K_pad * O_pad,
            transcendentals=0,
            bytes_accessed=(P_pad * K_pad * 2 + grid_p * K_pad * O_pad * 2
                            + P_pad * O_pad * 4 + O_pad * 4),
        ),
    )(sisw, patches, w_codes, bias_pad)

    # qo.update(y): finish the tile-level reduction (no extra HBM read of y).
    rmin = jnp.minimum(jnp.min(ymin_t), 0.0)
    rmax = jnp.maximum(jnp.max(ymax_t), 0.0)
    so, zo = _calc_scale_zp(rmin, rmax)
    qo_params = jnp.stack([1.0 / so, so, zo]).astype(jnp.float32)

    # ---- kernel 2: output fake-quant fused with the relayout to (N, O, H*W) ----
    out3 = pl.pallas_call(
        functools.partial(_fq_out_kernel, o_real=O),
        out_shape=jax.ShapeDtypeStruct((N, O, HWo), jnp.float32),
        grid=(N,),
        in_specs=[
            pl.BlockSpec(memory_space=pltpu.MemorySpace.SMEM),
            pl.BlockSpec((HWo, O_pad), lambda n: (n, 0)),
        ],
        out_specs=pl.BlockSpec((1, O, HWo), lambda n: (n, 0, 0)),
        compiler_params=pltpu.CompilerParams(dimension_semantics=("parallel",)),
    )(qo_params, y)

    return out3.reshape(N, O, Hout, Wout)


# ----------------------------- pure-JAX reference -----------------------------

def _ref_forward(x, weight, bias, *, stride=1, padding=1):
    si, zi = _qparams_from_tensor(x)
    sw, zw = _qparams_from_tensor(weight)
    xq = _fq_ref(x, si, zi)
    wq = _fq_ref(weight, sw, zw)
    y = jax.lax.conv_general_dilated(
        xq, wq, window_strides=(stride, stride),
        padding=[(padding, padding), (padding, padding)],
        dimension_numbers=("NCHW", "OIHW", "NCHW"),
        precision=jax.lax.Precision.HIGHEST)
    y = y + bias.reshape(1, -1, 1, 1)
    so, zo = _qparams_from_tensor(y)
    return _fq_ref(y, so, zo)


# ----------------------------- main -----------------------------

if __name__ == "__main__":
    key = jax.random.PRNGKey(0)
    kx, kw_, kb = jax.random.split(key, 3)

    # conv_module = nn.Conv2d(4, 8, kernel_size=3, stride=1, padding=1, bias=True)
    N, C, H, W = 2, 4, 16, 16
    O, KH, KW = 8, 3, 3
    STRIDE, PAD = 1, 1

    x = jax.random.normal(kx, (N, C, H, W), dtype=jnp.float32)
    fan_in = C * KH * KW
    bound = 1.0 / (fan_in ** 0.5)          # PyTorch Conv2d default uniform init range
    weight = jax.random.uniform(kw_, (O, C, KH, KW), jnp.float32, -bound, bound)
    bias = jax.random.uniform(kb, (O,), jnp.float32, -bound, bound)

    fwd = jax.jit(functools.partial(qconv2d_forward, stride=STRIDE, padding=PAD))
    out = jax.block_until_ready(fwd(x, weight, bias))

    ref = _ref_forward(x, weight, bias, stride=STRIDE, padding=PAD)
    Hout = (H + 2 * PAD - KH) // STRIDE + 1
    Wout = (W + 2 * PAD - KW) // STRIDE + 1
    assert out.shape == (N, O, Hout, Wout), out.shape
    max_err = float(jnp.max(jnp.abs(out - ref)))
    # generous tolerance: bf16-code MXU accumulation vs HIGHEST-precision f32 conv may
    # differ by a fraction of one quantization bin
    assert max_err < 5e-2, f"max abs err {max_err}"

    print("KERNEL_OK")
</pallas_src>

<mosaic_0001>
module attributes {stable_mosaic.version = 11 : i64} {
  func.func @_fq_codes_kernel(%arg0: i32, %arg1: memref<2xf32, #tpu.memory_space<smem>>, %arg2: memref<1x4x16x16xf32, #tpu.memory_space<vmem>>, %arg3: memref<1x4x16x16xbf16, #tpu.memory_space<vmem>>) attributes {dimension_semantics = [#tpu.dimension_semantics<parallel>], iteration_bounds = array<i64: 2>, scalar_prefetch = 0 : i64, scratch_operands = 0 : i64, tpu.core_type = #tpu.core_type<tc>, window_params = [{transform_indices = @transform_0, window_bounds = array<i64: 2>}, {transform_indices = @transform_1, window_bounds = array<i64: 1, 4, 16, 16>}, {transform_indices = @transform_2, window_bounds = array<i64: 1, 4, 16, 16>}]} {
    %c0 = arith.constant 0 : index
    %0 = memref.load %arg1[%c0] : memref<2xf32, #tpu.memory_space<smem>>
    %c1 = arith.constant 1 : index
    %1 = memref.load %arg1[%c1] : memref<2xf32, #tpu.memory_space<smem>>
    %c0_0 = arith.constant 0 : index
    %c0_1 = arith.constant 0 : index
    %c0_2 = arith.constant 0 : index
    %c0_3 = arith.constant 0 : index
    %2 = vector.load %arg2[%c0_0, %c0_1, %c0_2, %c0_3] : memref<1x4x16x16xf32, #tpu.memory_space<vmem>>, vector<1x4x16x16xf32>
    %3 = vector.broadcast %0 : f32 to vector<1x4x16x16xf32>
    %4 = arith.mulf %2, %3 : vector<1x4x16x16xf32>
    %5 = vector.broadcast %1 : f32 to vector<1x4x16x16xf32>
    %6 = arith.addf %4, %5 : vector<1x4x16x16xf32>
    %cst = arith.constant 0.000000e+00 : f32
    %cst_4 = arith.constant 2.550000e+02 : f32
    %7 = vector.broadcast %cst : f32 to vector<1x4x16x16xf32>
    %8 = arith.maximumf %7, %6 : vector<1x4x16x16xf32>
    %9 = vector.broadcast %cst_4 : f32 to vector<1x4x16x16xf32>
    %10 = arith.minimumf %9, %8 : vector<1x4x16x16xf32>
    %11 = math.roundeven %10 : vector<1x4x16x16xf32>
    %12 = vector.broadcast %1 : f32 to vector<1x4x16x16xf32>
    %13 = arith.subf %11, %12 : vector<1x4x16x16xf32>
    %14 = arith.truncf %13 : vector<1x4x16x16xf32> to vector<1x4x16x16xbf16>
    %c0_5 = arith.constant 0 : index
    %c0_6 = arith.constant 0 : index
    %c0_7 = arith.constant 0 : index
    %c0_8 = arith.constant 0 : index
    %15 = vector.load %arg3[%c0_5, %c0_6, %c0_7, %c0_8] : memref<1x4x16x16xbf16, #tpu.memory_space<vmem>>, vector<1x4x16x16xbf16>
    tpu.vector_store %arg3[%c0_5, %c0_6, %c0_7, %c0_8], %14 {strides = array<i32>} : memref<1x4x16x16xbf16, #tpu.memory_space<vmem>>, vector<1x4x16x16xbf16>,
    return
  }
  func.func @transform_0(%arg0: i32) -> i32 {
    %c0_i32 = arith.constant 0 : i32
    %c0_i32_0 = arith.constant 0 : i32
    return %c0_i32 : i32
  }
  func.func @transform_1(%arg0: i32) -> (i32, i32, i32, i32) {
    %c0_i32 = arith.constant 0 : i32
    %c0_i32_0 = arith.constant 0 : i32
    %c0_i32_1 = arith.constant 0 : i32
    %c0_i32_2 = arith.constant 0 : i32
    return %arg0, %c0_i32, %c0_i32_0, %c0_i32_1 : i32, i32, i32, i32
  }
  func.func @transform_2(%arg0: i32) -> (i32, i32, i32, i32) {
    %c0_i32 = arith.constant 0 : i32
    %c0_i32_0 = arith.constant 0 : i32
    %c0_i32_1 = arith.constant 0 : i32
    %c0_i32_2 = arith.constant 0 : i32
    return %arg0, %c0_i32, %c0_i32_0, %c0_i32_1 : i32, i32, i32, i32
  }
}

module attributes {stable_mosaic.version = 11 : i64} {
  func.func @_fq_codes_kernel(%arg0: memref<2xf32, #tpu.memory_space<smem>>, %arg1: memref<128x128xf32, #tpu.memory_space<vmem>>, %arg2: memref<128x128xbf16, #tpu.memory_space<vmem>>) attributes {dimension_semantics = [], scalar_prefetch = 0 : i64, scratch_operands = 0 : i64, tpu.core_type = #tpu.core_type<tc>} {
    %c0 = arith.constant 0 : index
    %0 = memref.load %arg0[%c0] : memref<2xf32, #tpu.memory_space<smem>>
    %c1 = arith.constant 1 : index
    %1 = memref.load %arg0[%c1] : memref<2xf32, #tpu.memory_space<smem>>
    %c0_0 = arith.constant 0 : index
    %c0_1 = arith.constant 0 : index
    %2 = vector.load %arg1[%c0_0, %c0_1] : memref<128x128xf32, #tpu.memory_space<vmem>>, vector<128x128xf32>
    %3 = vector.broadcast %0 : f32 to vector<128x128xf32>
    %4 = arith.mulf %2, %3 : vector<128x128xf32>
    %5 = vector.broadcast %1 : f32 to vector<128x128xf32>
    %6 = arith.addf %4, %5 : vector<128x128xf32>
    %cst = arith.constant 0.000000e+00 : f32
    %cst_2 = arith.constant 2.550000e+02 : f32
    %7 = vector.broadcast %cst : f32 to vector<128x128xf32>
    %8 = arith.maximumf %7, %6 : vector<128x128xf32>
    %9 = vector.broadcast %cst_2 : f32 to vector<128x128xf32>
    %10 = arith.minimumf %9, %8 : vector<128x128xf32>
    %11 = math.roundeven %10 : vector<128x128xf32>
    %12 = vector.broadcast %1 : f32 to vector<128x128xf32>
    %13 = arith.subf %11, %12 : vector<128x128xf32>
    %14 = arith.truncf %13 : vector<128x128xf32> to vector<128x128xbf16>
    %c0_3 = arith.constant 0 : index
    %c0_4 = arith.constant 0 : index
    %15 = vector.load %arg2[%c0_3, %c0_4] : memref<128x128xbf16, #tpu.memory_space<vmem>>, vector<128x128xbf16>
    tpu.vector_store %arg2[%c0_3, %c0_4], %14 {strides = array<i32>} : memref<128x128xbf16, #tpu.memory_space<vmem>>, vector<128x128xbf16>,
    return
  }
}

module attributes {stable_mosaic.version = 11 : i64} {
  func.func @_qconv_matmul_kernel(%arg0: i32, %arg1: i32, %arg2: memref<1xf32, #tpu.memory_space<smem>>, %arg3: memref<256x128xbf16, #tpu.memory_space<vmem>>, %arg4: memref<128x128xbf16, #tpu.memory_space<vmem>>, %arg5: memref<1x128xf32, #tpu.memory_space<vmem>>, %arg6: memref<256x128xf32, #tpu.memory_space<vmem>>, %arg7: memref<1x1x8x128xf32, #tpu.memory_space<vmem>>, %arg8: memref<1x1x8x128xf32, #tpu.memory_space<vmem>>) attributes {dimension_semantics = [#tpu.dimension_semantics<parallel>, #tpu.dimension_semantics<parallel>], iteration_bounds = array<i64: 2, 1>, scalar_prefetch = 0 : i64, scratch_operands = 0 : i64, tpu.core_type = #tpu.core_type<tc>, window_params = [{transform_indices = @transform_0, window_bounds = array<i64: 1>}, {transform_indices = @transform_1, window_bounds = array<i64: 256, 128>}, {transform_indices = @transform_2, window_bounds = array<i64: 128, 128>}, {transform_indices = @transform_3, window_bounds = array<i64: 1, 128>}, {transform_indices = @transform_4, window_bounds = array<i64: 256, 128>}, {transform_indices = @transform_5, window_bounds = array<i64: 1, 1, 8, 128>}, {transform_indices = @transform_6, window_bounds = array<i64: 1, 1, 8, 128>}]} {
    %c0 = arith.constant 0 : index
    %c0_0 = arith.constant 0 : index
    %0 = vector.load %arg3[%c0, %c0_0] : memref<256x128xbf16, #tpu.memory_space<vmem>>, vector<256x128xbf16>
    %c0_1 = arith.constant 0 : index
    %c0_2 = arith.constant 0 : index
    %1 = vector.load %arg4[%c0_1, %c0_2] : memref<128x128xbf16, #tpu.memory_space<vmem>>, vector<128x128xbf16>
    %cst = arith.constant dense<0.000000e+00> : vector<256x128xf32>
    %2 = tpu.matmul %0, %1, %cst {dimension_numbers = #tpu.dot_dimension_numbers<[1], [0], [0], [1], [0, 0, 1, 1], [], []>} : vector<256x128xbf16>, vector<128x128xbf16>, vector<256x128xf32> -> vector<256x128xf32>
    %c0_3 = arith.constant 0 : index
    %3 = memref.load %arg2[%c0_3] : memref<1xf32, #tpu.memory_space<smem>>
    %4 = vector.broadcast %3 : f32 to vector<256x128xf32>
    %5 = arith.mulf %2, %4 : vector<256x128xf32>
    %c0_4 = arith.constant 0 : index
    %c0_5 = arith.constant 0 : index
    %6 = vector.load %arg5[%c0_4, %c0_5] : memref<1x128xf32, #tpu.memory_space<vmem>>, vector<1x128xf32>
    %7 = vector.broadcast %6 : vector<1x128xf32> to vector<256x128xf32>
    %8 = arith.addf %5, %7 : vector<256x128xf32>
    %c0_6 = arith.constant 0 : index
    %c0_7 = arith.constant 0 : index
    %9 = vector.load %arg6[%c0_6, %c0_7] : memref<256x128xf32, #tpu.memory_space<vmem>>, vector<256x128xf32>
    tpu.vector_store %arg6[%c0_6, %c0_7], %8 {strides = array<i32>} : memref<256x128xf32, #tpu.memory_space<vmem>>, vector<256x128xf32>,
    %c256_i32 = arith.constant 256 : i32
    %10 = arith.muli %arg0, %c256_i32 : i32
    %11 = tpu.iota {dimensions = array<i32: 0>} : vector<256x128xi32>
    %12 = vector.broadcast %10 : i32 to vector<256x128xi32>
    %13 = arith.addi %12, %11 : vector<256x128xi32>
    %c512_i32 = arith.constant 512 : i32
    %14 = vector.broadcast %c512_i32 : i32 to vector<256x128xi32>
    %15 = arith.cmpi slt, %13, %14 : vector<256x128xi32>
    %cst_8 = arith.constant 0x7F800000 : f32
    %16 = vector.broadcast %cst_8 : f32 to vector<256x128xf32>
    %17 = arith.select %15, %8, %16 : vector<256x128xi1>, vector<256x128xf32>
    %18 = vector.shape_cast %17 : vector<256x128xf32> to vector<1x256x128xf32>
    %cst_9 = arith.constant dense<0x7F800000> : vector<1xf32>
    %19 = vector.multi_reduction <minimumf>, %18, %cst_9 [1, 2] : vector<1x256x128xf32> to vector<1xf32>
    %20 = vector.shape_cast %19 : vector<1xf32> to vector<1x1x1xf32>
    %21 = vector.extract %20[0, 0, 0] : f32 from vector<1x1x1xf32>
    %cst_10 = arith.constant 0xFF800000 : f32
    %22 = vector.broadcast %cst_10 : f32 to vector<256x128xf32>
    %23 = arith.select %15, %8, %22 : vector<256x128xi1>, vector<256x128xf32>
    %24 = vector.shape_cast %23 : vector<256x128xf32> to vector<1x256x128xf32>
    %cst_11 = arith.constant dense<0xFF800000> : vector<1xf32>
    %25 = vector.multi_reduction <maximumf>, %24, %cst_11 [1, 2] : vector<1x256x128xf32> to vector<1xf32>
    %26 = vector.shape_cast %25 : vector<1xf32> to vector<1x1x1xf32>
    %27 = vector.extract %26[0, 0, 0] : f32 from vector<1x1x1xf32>
    %28 = vector.broadcast %21 : f32 to vector<1x1x8x128xf32>
    %c0_12 = arith.constant 0 : index
    %c0_13 = arith.constant 0 : index
    %c0_14 = arith.constant 0 : index
    %c0_15 = arith.constant 0 : index
    %29 = vector.load %arg7[%c0_12, %c0_13, %c0_14, %c0_15] : memref<1x1x8x128xf32, #tpu.memory_space<vmem>>, vector<1x1x8x128xf32>
    tpu.vector_store %arg7[%c0_12, %c0_13, %c0_14, %c0_15], %28 {strides = array<i32>} : memref<1x1x8x128xf32, #tpu.memory_space<vmem>>, vector<1x1x8x128xf32>,
    %30 = vector.broadcast %27 : f32 to vector<1x1x8x128xf32>
    %c0_16 = arith.constant 0 : index
    %c0_17 = arith.constant 0 : index
    %c0_18 = arith.constant 0 : index
    %c0_19 = arith.constant 0 : index
    %31 = vector.load %arg8[%c0_16, %c0_17, %c0_18, %c0_19] : memref<1x1x8x128xf32, #tpu.memory_space<vmem>>, vector<1x1x8x128xf32>
    tpu.vector_store %arg8[%c0_16, %c0_17, %c0_18, %c0_19], %30 {strides = array<i32>} : memref<1x1x8x128xf32, #tpu.memory_space<vmem>>, vector<1x1x8x128xf32>,
    return
  }
  func.func @transform_0(%arg0: i32, %arg1: i32) -> i32 {
    %c0_i32 = arith.constant 0 : i32
    %c0_i32_0 = arith.constant 0 : i32
    return %c0_i32 : i32
  }
  func.func @transform_1(%arg0: i32, %arg1: i32) -> (i32, i32) {
    %c0_i32 = arith.constant 0 : i32
    %c0_i32_0 = arith.constant 0 : i32
    return %arg0, %c0_i32 : i32, i32
  }
  func.func @transform_2(%arg0: i32, %arg1: i32) -> (i32, i32) {
    %c0_i32 = arith.constant 0 : i32
    %c0_i32_0 = arith.constant 0 : i32
    return %c0_i32, %arg1 : i32, i32
  }
  func.func @transform_3(%arg0: i32, %arg1: i32) -> (i32, i32) {
    %c0_i32 = arith.constant 0 : i32
    %c0_i32_0 = arith.constant 0 : i32
    return %c0_i32, %arg1 : i32, i32
  }
  func.func @transform_4(%arg0: i32, %arg1: i32) -> (i32, i32) {
    %c0_i32 = arith.constant 0 : i32
    return %arg0, %arg1 : i32, i32
  }
  func.func @transform_5(%arg0: i32, %arg1: i32) -> (i32, i32, i32, i32) {
    %c0_i32 = arith.constant 0 : i32
    %c0_i32_0 = arith.constant 0 : i32
    %c0_i32_1 = arith.constant 0 : i32
    return %arg0, %arg1, %c0_i32, %c0_i32_0 : i32, i32, i32, i32
  }
  func.func @transform_6(%arg0: i32, %arg1: i32) -> (i32, i32, i32, i32) {
    %c0_i32 = arith.constant 0 : i32
    %c0_i32_0 = arith.constant 0 : i32
    %c0_i32_1 = arith.constant 0 : i32
    return %arg0, %arg1, %c0_i32, %c0_i32_0 : i32, i32, i32, i32
  }
}

module attributes {stable_mosaic.version = 11 : i64} {
  func.func @_fq_out_kernel(%arg0: i32, %arg1: memref<3xf32, #tpu.memory_space<smem>>, %arg2: memref<256x128xf32, #tpu.memory_space<vmem>>, %arg3: memref<1x8x256xf32, #tpu.memory_space<vmem>>) attributes {dimension_semantics = [#tpu.dimension_semantics<parallel>], iteration_bounds = array<i64: 2>, scalar_prefetch = 0 : i64, scratch_operands = 0 : i64, tpu.core_type = #tpu.core_type<tc>, window_params = [{transform_indices = @transform_0, window_bounds = array<i64: 3>}, {transform_indices = @transform_1, window_bounds = array<i64: 256, 128>}, {transform_indices = @transform_2, window_bounds = array<i64: 1, 8, 256>}]} {
    %c0 = arith.constant 0 : index
    %0 = memref.load %arg1[%c0] : memref<3xf32, #tpu.memory_space<smem>>
    %c1 = arith.constant 1 : index
    %1 = memref.load %arg1[%c1] : memref<3xf32, #tpu.memory_space<smem>>
    %c2 = arith.constant 2 : index
    %2 = memref.load %arg1[%c2] : memref<3xf32, #tpu.memory_space<smem>>
    %c0_0 = arith.constant 0 : index
    %c0_1 = arith.constant 0 : index
    %3 = vector.load %arg2[%c0_0, %c0_1] : memref<256x128xf32, #tpu.memory_space<vmem>>, vector<256x128xf32>
    %4 = vector.broadcast %0 : f32 to vector<256x128xf32>
    %5 = arith.mulf %3, %4 : vector<256x128xf32>
    %6 = vector.broadcast %2 : f32 to vector<256x128xf32>
    %7 = arith.addf %5, %6 : vector<256x128xf32>
    %cst = arith.constant 0.000000e+00 : f32
    %cst_2 = arith.constant 2.550000e+02 : f32
    %8 = vector.broadcast %cst : f32 to vector<256x128xf32>
    %9 = arith.maximumf %8, %7 : vector<256x128xf32>
    %10 = vector.broadcast %cst_2 : f32 to vector<256x128xf32>
    %11 = arith.minimumf %10, %9 : vector<256x128xf32>
    %12 = math.roundeven %11 : vector<256x128xf32>
    %13 = vector.broadcast %2 : f32 to vector<256x128xf32>
    %14 = arith.subf %12, %13 : vector<256x128xf32>
    %15 = vector.broadcast %1 : f32 to vector<256x128xf32>
    %16 = arith.mulf %15, %14 : vector<256x128xf32>
    %17 = tpu.transpose %16, [1, 0] : vector<256x128xf32> -> vector<128x256xf32>
    %18 = vector.extract_strided_slice %17 {offsets = [0, 0], sizes = [8, 256], strides = [1, 1]} : vector<128x256xf32> to vector<8x256xf32>
    %c0_3 = arith.constant 0 : index
    %c0_4 = arith.constant 0 : index
    %c0_5 = arith.constant 0 : index
    %19 = vector.load %arg3[%c0_3, %c0_4, %c0_5] : memref<1x8x256xf32, #tpu.memory_space<vmem>>, vector<1x8x256xf32>
    %20 = vector.shape_cast %19 : vector<1x8x256xf32> to vector<8x256xf32>
    %21 = vector.shape_cast %18 : vector<8x256xf32> to vector<1x8x256xf32>
    tpu.vector_store %arg3[%c0_3, %c0_4, %c0_5], %21 {strides = array<i32>} : memref<1x8x256xf32, #tpu.memory_space<vmem>>, vector<1x8x256xf32>,
    return
  }
  func.func @transform_0(%arg0: i32) -> i32 {
    %c0_i32 = arith.constant 0 : i32
    %c0_i32_0 = arith.constant 0 : i32
    return %c0_i32 : i32
  }
  func.func @transform_1(%arg0: i32) -> (i32, i32) {
    %c0_i32 = arith.constant 0 : i32
    %c0_i32_0 = arith.constant 0 : i32
    return %arg0, %c0_i32 : i32, i32
  }
  func.func @transform_2(%arg0: i32) -> (i32, i32, i32) {
    %c0_i32 = arith.constant 0 : i32
    %c0_i32_0 = arith.constant 0 : i32
    %c0_i32_1 = arith.constant 0 : i32
    return %arg0, %c0_i32, %c0_i32_0 : i32, i32, i32
  }
}

</mosaic_0001>

<bundles_post_ra>
// kernel: qconv2d_forward.4
= control target key start
LH: loop header
LB: loop body
LE: loop exit
PB: predicated region body
PF: predicated region fallthrough
CT: control target
= control target key end

     0   :  { %7 = vsyncpa [#allocation3], 0  ;;  %s444_s9 = smov 0   ;;  %s555_s0 = inlined_call_operand.vmem [shape: f32[2], index: 0, kind: input, shape index: {}]   ;;  %s556_s1 = inlined_call_operand.vmem [shape: f32[2,4,16,16], index: 1, kind: input, shape index: {}]   ;;  %s557_s2 = inlined_call_operand.vmem [shape: bf16[2,4,16,16], index: 2, kind: output, shape index: {}]  }
   0x1 LB: > { %s302_s10 = sadd.s32 4294967295, %s426_s9   ;;  %p304_p0 = scmp.ge.s32.totalorder %s426_s9, 1  ;;  %s426_s9 = sphi %s444_s9, %s13_s9  }
   0x2   : > { %p91_p1 = scmp.lt.s32.totalorder %s426_s9, 3  ;;  %s103_s13 = sshll.u32 %s555_s0, 4  ;;  %s104_s13 = int_to_ptr.vmem [resolvable:$true] %s103_s13 }
   0x3   : > { %p390_p3 = scmp.eq.s32.totalorder %s302_s10, 0  ;;  %s428_s14 = smov [#allocation2]  }
   0x4   : > { %p92_p2 = pnand %p304_p0, %p91_p1 }
   0x6   : > { %p386_p4 = pneg %p92_p2  ;;  %124 = sbr.rel (%p92_p2) target bundleno = 57 (0x39), region = 28 }
   0x8   : > { %p387_p5 = pnand %p390_p3, %p386_p4 }
   0xa   : > { %389 = dma.vmem_to_smem (!%p387_p5), %s104_s13, 16, %s428_s14, [#allocation3]  }
   0xb   : > { %421 = dma.done.wait (%p390_p3), [#allocation3], 16  }
   0xc   : > { %423 = vsyncadd (%p390_p3), [#allocation3], 4294967280 }
   0xd   : > { %131 = sfence }
   0xe   : > { %p148_p6 = scmp.lt.s32.totalorder %s302_s10, 1  ;;  %s158_s15 = sld [smem:[#allocation2]]  ;;  %vm226_vm1 = vcmask 125952  }
   0xf   : > { %s313_s16 = sld [smem:[#allocation2 + $0x1]] }
  0x10   : > { %s571_s10 = smov (!%p148_p6, %s302_s10), 1 }
  0x11   : > { %s316_s17 = sshll.u32 %s571_s10, 6  ;;  %s317_s21 = sshll.u32 %s571_s10, 5 }
  0x12   : > { %s152_s20 = scalar_lea.vmem %s556_s1, %s316_s17  ;;  %s514_s24 = scalar_lea.vmem %s557_s2, %s317_s21 }
  0x13   : > { %v160_v0 = vld [vmem:[%s152_s20] sm:$0xff]  ;;  %v161_v2 = vld [vmem:[%s152_s20 + $0x8] sm:$0xff]  ;;  %v162_v3 = vld [vmem:[%s152_s20 + $0x10] sm:$0xff] }
  0x14   : > { %v168_v1 = vstv %s158_s15  ;;  %v163_v8 = vld [vmem:[%s152_s20 + $0x18] sm:$0xff]  ;;  %v164_v9 = vld [vmem:[%s152_s20 + $0x20] sm:$0xff]  ;;  %v165_v10 = vld [vmem:[%s152_s20 + $0x28] sm:$0xff] }
  0x15   : > { %v169_v4 = vmul.f32 %v168_v1, %v160_v0  ;;  %v461_v5 = vstv %s313_s16  ;;  %v170_v6 = vmul.f32 %v168_v1, %v161_v2  ;;  %v171_v7 = vmul.f32 %v168_v1, %v162_v3  ;;  %v166_v14 = vld [vmem:[%s152_s20 + $0x30] sm:$0xff]  ;;  %v167_v15 = vld [vmem:[%s152_s20 + $0x38] sm:$0xff] }
  0x16   : > { %v172_v11 = vmul.f32 %v168_v1, %v163_v8  ;;  %v173_v12 = vmul.f32 %v168_v1, %v164_v9  ;;  %v174_v13 = vmul.f32 %v168_v1, %v165_v10  ;;  %v175_v19 = vmul.f32 %v168_v1, %v166_v14 }
  0x17   : > { %v178_v16 = vadd.f32 %v461_v5, %v169_v4  ;;  %v179_v17 = vadd.f32 %v461_v5, %v170_v6  ;;  %v180_v18 = vadd.f32 %v461_v5, %v171_v7  ;;  %v176_v23 = vmul.f32 %v168_v1, %v167_v15 }
  0x18   : > { %v181_v20 = vadd.f32 %v461_v5, %v172_v11  ;;  %v182_v21 = vadd.f32 %v461_v5, %v173_v12  ;;  %v183_v22 = vadd.f32 %v461_v5, %v174_v13  ;;  %v184_v27 = vadd.f32 %v461_v5, %v175_v19 }
  0x19   : > { %v186_v24 = vmax.f32 %v178_v16, 0.0  ;;  %v187_v25 = vmax.f32 %v179_v17, 0.0  ;;  %v188_v26 = vmax.f32 %v180_v18, 0.0  ;;  %v471_v31 = vadd.f32 %v461_v5, %v176_v23 }
  0x1a   : > { %v189_v28 = vmax.f32 %v181_v20, 0.0  ;;  %v190_v29 = vmax.f32 %v182_v21, 0.0  ;;  %v191_v30 = vmax.f32 %v183_v22, 0.0  ;;  %v192_v38 = vmax.f32 %v184_v27, 0.0 }
  0x1b   : > { %v194_v32 = vmin.f32 %v186_v24, 255.0  ;;  %v195_v33 = vmin.f32 %v187_v25, 255.0  ;;  %v196_v34 = vmin.f32 %v188_v26, 255.0  ;;  %v193_v42 = vmax.f32 %v471_v31, 0.0 }
  0x1c   : > { %v197_v35 = vmin.f32 %v189_v28, 255.0  ;;  %v473_v36 = vmin.f32 %v190_v29, 255.0  ;;  %v475_v37 = vmin.f32 %v191_v30, 255.0  ;;  %v200_v23 = vmin.f32 %v192_v38, 255.0 }
  0x1d   : > { %v318_v39 = vand.u32 2147483647, %v194_v32  ;;  %v320_v40 = vcvt.f32.s32 %v194_v32  ;;  %v326_v41 = vand.u32 2147483647, %v195_v33  ;;  %v323_v43 = vand.u32 2147483648, %v194_v32 }
  0x1e   : > { %v328_v44 = vcvt.f32.s32 %v195_v33  ;;  %v334_v45 = vand.u32 2147483647, %v196_v34  ;;  %v336_v46 = vcvt.f32.s32 %v196_v34  ;;  %v331_v50 = vand.u32 2147483648, %v195_v33 }
  0x1f   : > { %vm478_vm0 = vcmp.lt.f32.partialorder %v318_v39, 8388608.0  ;;  %v321_v48 = vcvt.s32.f32 %v320_v40  ;;  %vm482_vm2 = vcmp.lt.f32.partialorder %v326_v41, 8388608.0  ;;  %v339_v53 = vand.u32 2147483648, %v196_v34 }
  0x20   : > { %v329_v51 = vcvt.s32.f32 %v328_v44  ;;  %v337_v52 = vcvt.s32.f32 %v336_v46  ;;  %v342_v54 = vand.u32 2147483647, %v197_v35  ;;  %vm486_vm3 = vcmp.lt.f32.partialorder %v334_v45, 8388608.0 }
  0x21   : > { %v322_v55 = vand.u32 2147483647, %v321_v48  ;;  %v344_v57 = vcvt.f32.s32 %v197_v35  ;;  %v350_v58 = vand.u32 2147483647, %v473_v36  ;;  %v347_v61 = vand.u32 2147483648, %v197_v35 }
  0x22   : > { %v330_v59 = vand.u32 2147483647, %v329_v51  ;;  %v338_v60 = vand.u32 2147483647, %v337_v52  ;;  %v352_v62 = vcvt.f32.s32 %v473_v36  ;;  %vm492_vm4 = vcmp.lt.f32.partialorder %v342_v54, 8388608.0 }
  0x23   : > { %v324_v63 = vor.u32 %v323_v43, %v322_v55  ;;  %v345_v1 = vcvt.s32.f32 %v344_v57  ;;  %vm496_vm5 = vcmp.lt.f32.partialorder %v350_v58, 8388608.0  ;;  %v355_v7 = vand.u32 2147483648, %v473_v36 }
  0x24   : > { %v332_v3 = vor.u32 %v331_v50, %v330_v59  ;;  %v340_v4 = vor.u32 %v339_v53, %v338_v60  ;;  %v353_v6 = vcvt.s32.f32 %v352_v62  ;;  %v358_v10 = vand.u32 2147483647, %v475_v37 }
  0x25   : > { %v325_v8 = vsel %vm478_vm0, %v324_v63, %v194_v32  ;;  %v346_v9 = vand.u32 2147483647, %v345_v1  ;;  %v360_v11 = vcvt.f32.s32 %v475_v37  ;;  %v363_v19 = vand.u32 2147483648, %v475_v37 }
  0x26   : > { %v210_v12 = vsub.f32 %v325_v8, %v461_v5  ;;  %v333_v13 = vsel %vm482_vm2, %v332_v3, %v195_v33  ;;  %v341_v14 = vsel %vm486_vm3, %v340_v4, %v196_v34  ;;  %v354_v15 = vand.u32 2147483647, %v353_v6 }
  0x27   : > { %v211_v16 = vsub.f32 %v333_v13, %v461_v5  ;;  %v212_v17 = vsub.f32 %v341_v14, %v461_v5  ;;  %v348_v18 = vor.u32 %v347_v61, %v346_v9  ;;  %v361_v22 = vcvt.s32.f32 %v360_v11 }
  0x28   : > { %v218_v20 = vpack.c.bf16 %v210_v12, %v210_v12  ;;  %v356_v21 = vor.u32 %v355_v7, %v354_v15  ;;  %v201_v27 = vmin.f32 %v193_v42, 255.0  ;;  %vm530_vm6 = vcmp.lt.f32.partialorder %v358_v10, 8388608.0 }
  0x29   : > { %v219_v24 = vpack.c.bf16 %v211_v16, %v211_v16  ;;  %v220_v25 = vpack.c.bf16 %v212_v17, %v212_v17  ;;  %v349_v26 = vsel %vm492_vm4, %v348_v18, %v197_v35  ;;  %v362_v30 = vand.u32 2147483647, %v361_v22 }
  0x2a   : > { %227 = vst.msk [vmem:[%s514_s24] sm:$0xf] %vm226_vm1, %v218_v20  ;;  %v213_v28 = vsub.f32 %v349_v26, %v461_v5  ;;  %v357_v29 = vsel %vm496_vm5, %v356_v21, %v473_v36  ;;  %v368_v33 = vcvt.f32.s32 %v200_v23  ;;  %v366_v38 = vand.u32 2147483647, %v200_v23 }
  0x2b   : > { %228 = vst.msk [vmem:[%s514_s24 + $0x4] sm:$0xf] %vm226_vm1, %v219_v24  ;;  %v214_v31 = vsub.f32 %v357_v29, %v461_v5  ;;  %v364_v35 = vor.u32 %v363_v19, %v362_v30  ;;  %v376_v39 = vcvt.f32.s32 %v201_v27  ;;  %v371_v36 = vand.u32 2147483648, %v200_v23 }
  0x2c   : > { %229 = vst.msk [vmem:[%s514_s24 + $0x8] sm:$0xf] %vm226_vm1, %v220_v25  ;;  %v221_v34 = vpack.c.bf16 %v213_v28, %v213_v28  ;;  %v369_v41 = vcvt.s32.f32 %v368_v33  ;;  %v374_v42 = vand.u32 2147483647, %v201_v27  ;;  %v379_v45 = vand.u32 2147483648, %v201_v27 }
  0x2d   : > { %v222_v40 = vpack.c.bf16 %v214_v31, %v214_v31  ;;  %v365_v43 = vsel %vm530_vm6, %v364_v35, %v475_v37  ;;  %v377_v44 = vcvt.s32.f32 %v376_v39  ;;  %vm367_vm7 = vcmp.lt.f32.partialorder %v366_v38, 8388608.0 }
  0x2e   : > { %230 = vst.msk [vmem:[%s514_s24 + $0xc] sm:$0xf] %vm226_vm1, %v221_v34  ;;  %v215_v46 = vsub.f32 %v365_v43, %v461_v5  ;;  %v370_v47 = vand.u32 2147483647, %v369_v41  ;;  %vm375_vm8 = vcmp.lt.f32.partialorder %v374_v42, 8388608.0 }
  0x2f   : > { %231 = vst.msk [vmem:[%s514_s24 + $0x10] sm:$0xf] %vm226_vm1, %v222_v40  ;;  %v378_v48 = vand.u32 2147483647, %v377_v44 }
  0x30   : > { %v223_v49 = vpack.c.bf16 %v215_v46, %v215_v46  ;;  %v372_v50 = vor.u32 %v371_v36, %v370_v47 }
  0x31   : > { %v380_v51 = vor.u32 %v379_v45, %v378_v48 }
  0x32   : > { %232 = vst.msk [vmem:[%s514_s24 + $0x14] sm:$0xf] %vm226_vm1, %v223_v49  ;;  %v373_v52 = vsel %vm367_vm7, %v372_v50, %v200_v23 }
  0x33   : > { %v216_v37 = vsub.f32 %v373_v52, %v461_v5  ;;  %v381_v53 = vsel %vm375_vm8, %v380_v51, %v201_v27 }
  0x34   : > { %v217_v54 = vsub.f32 %v381_v53, %v461_v5 }
  0x35   : > { %v224_v55 = vpack.c.bf16 %v216_v37, %v216_v37 }
  0x36   : > { %v225_v56 = vpack.c.bf16 %v217_v54, %v217_v54 }
  0x37   : > { %233 = vst.msk [vmem:[%s514_s24 + $0x18] sm:$0xf] %vm226_vm1, %v224_v55 }
  0x38   : > { %234 = vst.msk [vmem:[%s514_s24 + $0x1c] sm:$0xf] %vm226_vm1, %v225_v56 }
  0x39 PF: > { %s13_s9 = sadd.s32 1, %s426_s9  }
  0x3a   : > { %p10_p7 = scmp.ge.s32.totalorder %s13_s9, 4  }
  0x3c   :  { %12 = sbr.rel (!%p10_p7) target bundleno = 1 (0x1), region = 63 }
  0x41   :  { %256 = vsyncpa [#allocation3], 1 }
  0x42   :  { %258 = vsyncpa [#allocation3 + $0x1], 1 }

// kernel: qconv2d_forward.5
= control target key start
LH: loop header
LB: loop body
LE: loop exit
PB: predicated region body
PF: predicated region fallthrough
CT: control target
= control target key end

     0   :  { %7 = vsyncpa [#allocation3], 0  ;;  %s368_s12 = smov [#allocation2]   ;;  %s601_s0 = inlined_call_operand.vmem [shape: f32[2], index: 0, kind: input, shape index: {}]   ;;  %s602_s1 = inlined_call_operand.vmem [shape: f32[128,128], index: 1, kind: input, shape index: {}]   ;;  %s603_s2 = inlined_call_operand.vmem [shape: bf16[128,128], index: 2, kind: output, shape index: {}]  }
   0x1   :  { %s13_s11 = sshll.u32 %s601_s0, 4  ;;  %s14_s11 = int_to_ptr.vmem [resolvable:$true] %s13_s11 }
   0x2   :  { %16 = dma.vmem_to_smem %s14_s11, 16, %s368_s12, [#allocation3]  }
   0x3   :  { %366 = dma.done.wait [#allocation3], 16  }
   0x4   :  { %367 = vsyncadd [#allocation3], 4294967280 }
   0x5   :  { %23 = sfence }
   0x6   :  { %s24_s13 = sld [smem:[#allocation2]]  ;;  %v26_v0 = vld [vmem:[%s602_s1] sm:$0xff]  ;;  %v27_v1 = vld [vmem:[%s602_s1 + $0x8] sm:$0xff]  ;;  %v28_v2 = vld [vmem:[%s602_s1 + $0x10] sm:$0xff] }
   0x7   :  { %s177_s14 = sld [smem:[#allocation2 + $0x1]]  ;;  %v29_v3 = vld [vmem:[%s602_s1 + $0x18] sm:$0xff]  ;;  %v30_v4 = vld [vmem:[%s602_s1 + $0x20] sm:$0xff]  ;;  %v31_v5 = vld [vmem:[%s602_s1 + $0x28] sm:$0xff] }
   0x8   :  { %v32_v6 = vld [vmem:[%s602_s1 + $0x30] sm:$0xff]  ;;  %v33_v8 = vld [vmem:[%s602_s1 + $0x38] sm:$0xff] }
   0xc   :  { %v408_v7 = vstv %s24_s13 }
   0xd   :  { %v43_v9 = vmul.f32 %v408_v7, %v26_v0  ;;  %v44_v10 = vmul.f32 %v408_v7, %v27_v1  ;;  %v415_v11 = vstv %s177_s14  ;;  %v45_v12 = vmul.f32 %v408_v7, %v28_v2 }
   0xe   :  { %v46_v13 = vmul.f32 %v408_v7, %v29_v3  ;;  %v47_v14 = vmul.f32 %v408_v7, %v30_v4  ;;  %v48_v15 = vmul.f32 %v408_v7, %v31_v5  ;;  %v49_v16 = vmul.f32 %v408_v7, %v32_v6 }
   0xf   :  { %v60_v17 = vadd.f32 %v415_v11, %v43_v9  ;;  %v61_v18 = vadd.f32 %v415_v11, %v44_v10  ;;  %v62_v19 = vadd.f32 %v415_v11, %v45_v12  ;;  %v50_v20 = vmul.f32 %v408_v7, %v33_v8 }
  0x10   :  { %v63_v21 = vadd.f32 %v415_v11, %v46_v13  ;;  %v64_v22 = vadd.f32 %v415_v11, %v47_v14  ;;  %v65_v23 = vadd.f32 %v415_v11, %v48_v15  ;;  %v66_v24 = vadd.f32 %v415_v11, %v49_v16 }
  0x11   :  { %v76_v25 = vmax.f32 %v60_v17, 0.0  ;;  %v77_v26 = vmax.f32 %v61_v18, 0.0  ;;  %v78_v27 = vmax.f32 %v62_v19, 0.0  ;;  %v67_v28 = vadd.f32 %v415_v11, %v50_v20 }
  0x12   :  { %v79_v29 = vmax.f32 %v63_v21, 0.0  ;;  %v80_v30 = vmax.f32 %v64_v22, 0.0  ;;  %v81_v31 = vmax.f32 %v65_v23, 0.0  ;;  %v82_v32 = vmax.f32 %v66_v24, 0.0 }
  0x13   :  { %v92_v33 = vmin.f32 %v76_v25, 255.0  ;;  %v93_v34 = vmin.f32 %v77_v26, 255.0  ;;  %v94_v35 = vmin.f32 %v78_v27, 255.0  ;;  %v83_v36 = vmax.f32 %v67_v28, 0.0 }
  0x14   :  { %v95_v37 = vmin.f32 %v79_v29, 255.0  ;;  %v431_v38 = vmin.f32 %v80_v30, 255.0  ;;  %v433_v39 = vmin.f32 %v81_v31, 255.0  ;;  %v435_v40 = vmin.f32 %v82_v32, 255.0  ;;  %v34_v31 = vld [vmem:[%s602_s1 + $0x40] sm:$0xff] }
  0x15   :  { %v225_v41 = vand.u32 2147483647, %v92_v33  ;;  %v227_v42 = vcvt.f32.s32 %v92_v33  ;;  %v230_v43 = vand.u32 2147483648, %v92_v33  ;;  %v233_v44 = vand.u32 2147483647, %v93_v34 }
  0x16   :  { %v235_v45 = vcvt.f32.s32 %v93_v34  ;;  %v238_v46 = vand.u32 2147483648, %v93_v34  ;;  %v241_v47 = vand.u32 2147483647, %v94_v35  ;;  %v243_v48 = vcvt.f32.s32 %v94_v35 }
  0x17   :  { %vm437_vm0 = vcmp.lt.f32.partialorder %v225_v41, 8388608.0  ;;  %v228_v50 = vcvt.s32.f32 %v227_v42  ;;  %vm441_vm1 = vcmp.lt.f32.partialorder %v233_v44, 8388608.0  ;;  %v246_v52 = vand.u32 2147483648, %v94_v35  ;;  %v37_v44 = vld [vmem:[%s602_s1 + $0x58] sm:$0xff] }
  0x18   :  { %v236_v53 = vcvt.s32.f32 %v235_v45  ;;  %vm445_vm2 = vcmp.lt.f32.partialorder %v241_v47, 8388608.0  ;;  %v244_v55 = vcvt.s32.f32 %v243_v48  ;;  %v249_v56 = vand.u32 2147483647, %v95_v37 }
  0x19   :  { %v229_v57 = vand.u32 2147483647, %v228_v50  ;;  %v251_v58 = vcvt.f32.s32 %v95_v37  ;;  %v254_v59 = vand.u32 2147483648, %v95_v37  ;;  %v257_v60 = vand.u32 2147483647, %v431_v38 }
  0x1a   :  { %v237_v61 = vand.u32 2147483647, %v236_v53  ;;  %v245_v62 = vand.u32 2147483647, %v244_v55  ;;  %vm450_vm3 = vcmp.lt.f32.partialorder %v249_v56, 8388608.0  ;;  %v259_v0 = vcvt.f32.s32 %v431_v38  ;;  %v38_v53 = vld [vmem:[%s602_s1 + $0x60] sm:$0xff] }
  0x1b   :  { %v231_v1 = vor.u32 %v230_v43, %v229_v57  ;;  %v252_v2 = vcvt.s32.f32 %v251_v58  ;;  %vm455_vm4 = vcmp.lt.f32.partialorder %v257_v60, 8388608.0  ;;  %v262_v4 = vand.u32 2147483648, %v431_v38 }
  0x1c   :  { %v239_v5 = vor.u32 %v238_v46, %v237_v61  ;;  %v247_v6 = vor.u32 %v246_v52, %v245_v62  ;;  %v260_v8 = vcvt.s32.f32 %v259_v0  ;;  %v265_v9 = vand.u32 2147483647, %v433_v39 }
  0x1d   :  { %v232_v10 = vsel %vm437_vm0, %v231_v1, %v92_v33  ;;  %v253_v12 = vand.u32 2147483647, %v252_v2  ;;  %v267_v13 = vcvt.f32.s32 %v433_v39  ;;  %v270_v14 = vand.u32 2147483648, %v433_v39 }
  0x1e   :  { %v240_v15 = vsel %vm441_vm1, %v239_v5, %v93_v34  ;;  %v124_v16 = vsub.f32 %v232_v10, %v415_v11  ;;  %v248_v17 = vsel %vm445_vm2, %v247_v6, %v94_v35  ;;  %v261_v18 = vand.u32 2147483647, %v260_v8 }
  0x1f   :  { %v125_v19 = vsub.f32 %v240_v15, %v415_v11  ;;  %v255_v20 = vor.u32 %v254_v59, %v253_v12  ;;  %v126_v21 = vsub.f32 %v248_v17, %v415_v11  ;;  %vm472_vm5 = vcmp.lt.f32.partialorder %v265_v9, 8388608.0 }
  0x20   :  { %v263_v23 = vor.u32 %v262_v4, %v261_v18  ;;  %v268_v24 = vcvt.s32.f32 %v267_v13  ;;  %v99_v25 = vmin.f32 %v83_v36, 255.0  ;;  %v273_v26 = vand.u32 2147483647, %v435_v40  ;;  %v35_v36 = vld [vmem:[%s602_s1 + $0x48] sm:$0xff] }
  0x21   :  { %v181_v27 = vpack.c.bf16 %v125_v19, %v124_v16  ;;  %v256_v28 = vsel %vm450_vm3, %v255_v20, %v95_v37  ;;  %v275_v29 = vcvt.f32.s32 %v435_v40  ;;  %v278_v30 = vand.u32 2147483648, %v435_v40 }
  0x22   :  { %v127_v32 = vsub.f32 %v256_v28, %v415_v11  ;;  %v264_v33 = vsel %vm455_vm4, %v263_v23, %v431_v38  ;;  %v269_v34 = vand.u32 2147483647, %v268_v24  ;;  %vm488_vm6 = vcmp.lt.f32.partialorder %v273_v26, 8388608.0  ;;  %v36_v38 = vld [vmem:[%s602_s1 + $0x50] sm:$0xff] }
  0x23   :  { %182 = vst [vmem:[%s603_s2] sm:$0xff] %v181_v27   ;;  %v128_v37 = vsub.f32 %v264_v33, %v415_v11  ;;  %v276_v41 = vcvt.s32.f32 %v275_v29  ;;  %v281_v42 = vand.u32 2147483647, %v99_v25  ;;  %v283_v43 = vcvt.f32.s32 %v99_v25 }
  0x24   :  { %v186_v45 = vpack.c.bf16 %v127_v32, %v126_v21  ;;  %v271_v46 = vor.u32 %v270_v14, %v269_v34  ;;  %v286_v47 = vand.u32 2147483648, %v99_v25  ;;  %v51_v48 = vmul.f32 %v408_v7, %v34_v31  ;;  %v40_v31 = vld [vmem:[%s602_s1 + $0x70] sm:$0xff] }
  0x25   :  { %v277_v49 = vand.u32 2147483647, %v276_v41  ;;  %vm506_vm7 = vcmp.lt.f32.partialorder %v281_v42, 8388608.0  ;;  %v284_v51 = vcvt.s32.f32 %v283_v43  ;;  %v52_v52 = vmul.f32 %v408_v7, %v35_v36  ;;  %v41_v43 = vld [vmem:[%s602_s1 + $0x78] sm:$0xff] }
  0x26   :  { %218 = vst [vmem:[%s603_s2 + $0x8] sm:$0xff] %v186_v45   ;;  %v272_v54 = vsel %vm472_vm5, %v271_v46, %v433_v39  ;;  %v68_v55 = vadd.f32 %v415_v11, %v51_v48  ;;  %v53_v56 = vmul.f32 %v408_v7, %v36_v38  ;;  %v54_v57 = vmul.f32 %v408_v7, %v37_v44  ;;  %v39_v39 = vld [vmem:[%s602_s1 + $0x68] sm:$0xff] }
  0x27   :  { %v129_v58 = vsub.f32 %v272_v54, %v415_v11  ;;  %v279_v59 = vor.u32 %v278_v30, %v277_v49  ;;  %v285_v60 = vand.u32 2147483647, %v284_v51  ;;  %v69_v61 = vadd.f32 %v415_v11, %v52_v52 }
  0x28   :  { %v84_v62 = vmax.f32 %v68_v55, 0.0  ;;  %v70_v63 = vadd.f32 %v415_v11, %v53_v56  ;;  %v71_v0 = vadd.f32 %v415_v11, %v54_v57  ;;  %v55_v1 = vmul.f32 %v408_v7, %v38_v53 }
  0x29   :  { %v191_v2 = vpack.c.bf16 %v129_v58, %v128_v37  ;;  %v280_v3 = vsel %vm488_vm6, %v279_v59, %v435_v40  ;;  %v287_v4 = vor.u32 %v286_v47, %v285_v60  ;;  %v85_v5 = vmax.f32 %v69_v61, 0.0 }
  0x2a   :  { %v130_v6 = vsub.f32 %v280_v3, %v415_v11  ;;  %v100_v8 = vmin.f32 %v84_v62, 255.0  ;;  %v86_v9 = vmax.f32 %v70_v63, 0.0  ;;  %v87_v10 = vmax.f32 %v71_v0, 0.0 }
  0x2b   :  { %219 = vst [vmem:[%s603_s2 + $0x10] sm:$0xff] %v191_v2   ;;  %v288_v12 = vsel %vm506_vm7, %v287_v4, %v99_v25  ;;  %v101_v13 = vmin.f32 %v85_v5, 255.0  ;;  %v56_v14 = vmul.f32 %v408_v7, %v39_v39  ;;  %v72_v15 = vadd.f32 %v415_v11, %v55_v1 }
  0x2c   :  { %v131_v40 = vsub.f32 %v288_v12, %v415_v11  ;;  %v289_v16 = vand.u32 2147483647, %v100_v8  ;;  %v291_v17 = vcvt.f32.s32 %v100_v8  ;;  %v294_v18 = vand.u32 2147483648, %v100_v8 }
  0x2d   :  { %v297_v19 = vand.u32 2147483647, %v101_v13  ;;  %v299_v20 = vcvt.f32.s32 %v101_v13  ;;  %v302_v21 = vand.u32 2147483648, %v101_v13  ;;  %v102_v22 = vmin.f32 %v86_v9, 255.0 }
  0x2e   :  { %v196_v23 = vpack.c.bf16 %v131_v40, %v130_v6  ;;  %vm543_vm8 = vcmp.lt.f32.partialorder %v289_v16, 8388608.0  ;;  %v292_v25 = vcvt.s32.f32 %v291_v17  ;;  %v103_v26 = vmin.f32 %v87_v10, 255.0 }
  0x2f   :  { %vm547_vm9 = vcmp.lt.f32.partialorder %v297_v19, 8388608.0  ;;  %v300_v28 = vcvt.s32.f32 %v299_v20  ;;  %v305_v29 = vand.u32 2147483647, %v102_v22  ;;  %v307_v30 = vcvt.f32.s32 %v102_v22 }
  0x30   :  { %220 = vst [vmem:[%s603_s2 + $0x18] sm:$0xff] %v196_v23   ;;  %v293_v32 = vand.u32 2147483647, %v292_v25  ;;  %v310_v33 = vand.u32 2147483648, %v102_v22  ;;  %v313_v34 = vand.u32 2147483647, %v103_v26  ;;  %v315_v35 = vcvt.f32.s32 %v103_v26 }
  0x31   :  { %v301_v36 = vand.u32 2147483647, %v300_v28  ;;  %vm557_vm10 = vcmp.lt.f32.partialorder %v305_v29, 8388608.0  ;;  %v308_v41 = vcvt.s32.f32 %v307_v30  ;;  %v318_v42 = vand.u32 2147483648, %v103_v26 }
  0x32   :  { %v295_v38 = vor.u32 %v294_v18, %v293_v32  ;;  %vm564_vm11 = vcmp.lt.f32.partialorder %v313_v34, 8388608.0  ;;  %v316_v45 = vcvt.s32.f32 %v315_v35  ;;  %v73_v46 = vadd.f32 %v415_v11, %v56_v14 }
  0x33   :  { %v303_v47 = vor.u32 %v302_v21, %v301_v36  ;;  %v309_v48 = vand.u32 2147483647, %v308_v41  ;;  %v88_v49 = vmax.f32 %v72_v15, 0.0  ;;  %v57_v50 = vmul.f32 %v408_v7, %v40_v31 }
  0x34   :  { %v296_v51 = vsel %vm543_vm8, %v295_v38, %v100_v8  ;;  %v317_v52 = vand.u32 2147483647, %v316_v45  ;;  %v89_v53 = vmax.f32 %v73_v46, 0.0  ;;  %v58_v54 = vmul.f32 %v408_v7, %v41_v43 }
  0x35   :  { %v304_v55 = vsel %vm547_vm9, %v303_v47, %v101_v13  ;;  %v132_v56 = vsub.f32 %v296_v51, %v415_v11  ;;  %v311_v57 = vor.u32 %v310_v33, %v309_v48  ;;  %v104_v58 = vmin.f32 %v88_v49, 255.0 }
  0x36   :  { %v133_v59 = vsub.f32 %v304_v55, %v415_v11  ;;  %v319_v60 = vor.u32 %v318_v42, %v317_v52  ;;  %v105_v61 = vmin.f32 %v89_v53, 255.0  ;;  %v74_v62 = vadd.f32 %v415_v11, %v57_v50 }
  0x37   :  { %v312_v63 = vsel %vm557_vm10, %v311_v57, %v102_v22  ;;  %v323_v0 = vcvt.f32.s32 %v104_v58  ;;  %v321_v2 = vand.u32 2147483647, %v104_v58  ;;  %v326_v5 = vand.u32 2147483648, %v104_v58 }
  0x38   :  { %v201_v39 = vpack.c.bf16 %v133_v59, %v132_v56  ;;  %v320_v7 = vsel %vm564_vm11, %v319_v60, %v103_v26  ;;  %v134_v1 = vsub.f32 %v312_v63, %v415_v11  ;;  %v331_v6 = vcvt.f32.s32 %v105_v61 }
  0x39   :  { %v135_v3 = vsub.f32 %v320_v7, %v415_v11  ;;  %v324_v4 = vcvt.s32.f32 %v323_v0  ;;  %v329_v8 = vand.u32 2147483647, %v105_v61  ;;  %v75_v9 = vadd.f32 %v415_v11, %v58_v54 }
  0x3a   :  { %221 = vst [vmem:[%s603_s2 + $0x20] sm:$0xff] %v201_v39   ;;  %v90_v10 = vmax.f32 %v74_v62, 0.0  ;;  %v332_v14 = vcvt.s32.f32 %v331_v6  ;;  %v334_v15 = vand.u32 2147483648, %v105_v61  ;;  %vm322_vm12 = vcmp.lt.f32.partialorder %v321_v2, 8388608.0 }
  0x3b   :  { %v206_v12 = vpack.c.bf16 %v135_v3, %v134_v1  ;;  %v325_v13 = vand.u32 2147483647, %v324_v4  ;;  %v91_v40 = vmax.f32 %v75_v9, 0.0  ;;  %vm330_vm13 = vcmp.lt.f32.partialorder %v329_v8, 8388608.0 }
  0x3c   :  { %v106_v16 = vmin.f32 %v90_v10, 255.0  ;;  %v333_v18 = vand.u32 2147483647, %v332_v14 }
  0x3d   :  { %222 = vst [vmem:[%s603_s2 + $0x28] sm:$0xff] %v206_v12   ;;  %v327_v17 = vor.u32 %v326_v5, %v325_v13  ;;  %v107_v19 = vmin.f32 %v91_v40, 255.0 }
  0x3e   :  { %v339_v20 = vcvt.f32.s32 %v106_v16  ;;  %v335_v22 = vor.u32 %v334_v15, %v333_v18  ;;  %v337_v23 = vand.u32 2147483647, %v106_v16  ;;  %v342_v26 = vand.u32 2147483648, %v106_v16 }
  0x3f   :  { %v328_v21 = vsel %vm322_vm12, %v327_v17, %v104_v58  ;;  %v347_v28 = vcvt.f32.s32 %v107_v19  ;;  %v345_v31 = vand.u32 2147483647, %v107_v19  ;;  %v350_v33 = vand.u32 2147483648, %v107_v19 }
  0x40   :  { %v136_v24 = vsub.f32 %v328_v21, %v415_v11  ;;  %v340_v25 = vcvt.s32.f32 %v339_v20  ;;  %v336_v27 = vsel %vm330_vm13, %v335_v22, %v105_v61  ;;  %vm338_vm14 = vcmp.lt.f32.partialorder %v337_v23, 8388608.0 }
  0x41   :  { %v137_v29 = vsub.f32 %v336_v27, %v415_v11  ;;  %v348_v32 = vcvt.s32.f32 %v347_v28  ;;  %vm346_vm15 = vcmp.lt.f32.partialorder %v345_v31, 8388608.0 }
  0x42   :  { %v341_v30 = vand.u32 2147483647, %v340_v25 }
  0x43   :  { %v211_v34 = vpack.c.bf16 %v137_v29, %v136_v24  ;;  %v349_v36 = vand.u32 2147483647, %v348_v32 }
  0x44   :  { %v343_v35 = vor.u32 %v342_v26, %v341_v30 }
  0x45   :  { %223 = vst [vmem:[%s603_s2 + $0x30] sm:$0xff] %v211_v34   ;;  %v351_v41 = vor.u32 %v350_v33, %v349_v36 }
  0x46   :  { %v344_v37 = vsel %vm338_vm14, %v343_v35, %v106_v16 }
  0x47   :  { %v138_v42 = vsub.f32 %v344_v37, %v415_v11  ;;  %v352_v43 = vsel %vm346_vm15, %v351_v41, %v107_v19 }
  0x48   :  { %v139_v38 = vsub.f32 %v352_v43, %v415_v11 }
  0x4a   :  { %v216_v44 = vpack.c.bf16 %v139_v38, %v138_v42 }
  0x4c   :  { %224 = vst [vmem:[%s603_s2 + $0x38] sm:$0xff] %v216_v44  }
  0x4d   :  { %176 = vsyncpa [#allocation3], 1 }

// kernel: qconv2d_forward.6
= control target key start
LH: loop header
LB: loop body
LE: loop exit
PB: predicated region body
PF: predicated region fallthrough
CT: control target
= control target key end

     0   :  { %s1409_s23 = smov 0   ;;  %s1411_s24 = smov 0   ;;  %s1824_s0 = inlined_call_operand.<no memory space> [shape: f32[1], index: 0, kind: input, shape index: {}]   ;;  %s1825_s1 = inlined_call_operand.vmem [shape: bf16[512,128], index: 1, kind: input, shape index: {}]   ;;  %s1826_s2 = inlined_call_operand.vmem [shape: bf16[128,128], index: 2, kind: input, shape index: {}]   ;;  %s1827_s3 = inlined_call_operand.vmem [shape: f32[1,128], index: 3, kind: input, shape index: {}]   ;;  %s1828_s4 = inlined_call_operand.vmem [shape: f32[512,128], index: 4, kind: output, shape index: {0}]   ;;  %s1829_s5 = inlined_call_operand.vmem [shape: f32[2,1,8,128], index: 5, kind: output, shape index: {1}]   ;;  %s1830_s6 = inlined_call_operand.vmem [shape: f32[2,1,8,128], index: 6, kind: output, shape index: {2}]  }
   0x1   :  { %12 = sst [smem:[#allocation2]] %s1824_s0  ;;  %s1413_s25 = smov 0  }
   0x2 LB: > { %s30_s0 = sadd.s32 1, %s1365_s24  ;;  %p1164_p0 = scmp.ge.s32.totalorder %s1369_s25, 1  ;;  %s1369_s25 = sphi %s1413_s25, %s18_s25   ;;  %s1365_s24 = sphi %s1411_s24, %s1832_s24   ;;  %s1361_s23 = sphi %s1409_s23, %s1831_s23  }
   0x3   : > { %p32_p1 = scmp.ge.s32.totalorder %s30_s0, 2  ;;  %p254_p2 = scmp.lt.s32.totalorder %s1369_s25, 3 }
   0x5   : > { %s1834_s0 = smov (%p32_p1, %s30_s0), 0  ;;  %p255_p3 = pnand %p1164_p0, %p254_p2 }
   0x6   : > { %s1165_s10 = sshll.u32 (!%p255_p3), %s1361_s23, 5  ;;  %s625_s26 = sld [smem:[#allocation2]] (!%p255_p3) }
   0x7   : > { %258 = sbr.rel (%p255_p3) target bundleno = 444 (0x1bc), region = 36  ;;  %p309_p4 = scmp.lt.s32.totalorder (!%p255_p3), %s1165_s10, 63 }
   0x8   : > { %s1267_s27 = sshll.u32 (!%p255_p3), %s1361_s23, 8  ;;  %p330_p5 = scmp.lt.s32.totalorder (!%p255_p3), %s1361_s23, 1 }
   0xc   : > { %v1293_v0 = vld [vmem:[%s1826_s2 + $0x38] sm:$0xff]  ;;  %v1292_v1 = vld [vmem:[%s1826_s2 + $0x30] sm:$0xff]  ;;  %v1291_v2 = vld [vmem:[%s1826_s2 + $0x28] sm:$0xff]  ;;  %s1836_s10 = smov (!%p309_p4, %s1165_s10), 63  ;;  %v728_v24 = vlaneseq  ;;  %v1481_v26 = vstv %s1267_s27  ;;  %s1838_s23 = smov (!%p330_p5, %s1361_s23), 1 }
   0xd   : > { %536 = vmatpush.bf16.msra.mxu0 %v1293_v0  ;;  %1294 = vmatpush.bf16.msra.mxu1 %v1293_v0  ;;  %v1290_v3 = vld [vmem:[%s1826_s2 + $0x20] sm:$0xff]  ;;  %v1289_v4 = vld [vmem:[%s1826_s2 + $0x18] sm:$0xff]  ;;  %v1288_v5 = vld [vmem:[%s1826_s2 + $0x10] sm:$0xff]  ;;  %s1166_s17 = sshll.u32 %s1836_s10, 2  ;;  %v1485_v29 = vstv %s625_s26  ;;  %s1168_s28 = sshll.u32 %s1836_s10, 3 }
   0xe   : > { %1295 = vmatpush.bf16.msra.mxu2 %v1293_v0  ;;  %1296 = vmatpush.bf16.msra.mxu3 %v1293_v0  ;;  %v1287_v6 = vld [vmem:[%s1826_s2 + $0x8] sm:$0xff]  ;;  %v1286_v7 = vld [vmem:[%s1826_s2] sm:$0xff]  ;;  %s1460_s22 = scalar_lea.vmem %s1825_s1, %s1166_s17  ;;  %v1478_v25 = vshrl.u32 %v728_v24, 7  ;;  %s1504_s9 = scalar_lea.vmem %s1828_s4, %s1168_s28 }
   0xf   : > { %v1270_v8 = vld [vmem:[%s1460_s22] sm:$0xff]  ;;  %v1271_v12 = vld [vmem:[%s1460_s22 + $0x8] sm:$0xff]  ;;  %v1272_v16 = vld [vmem:[%s1460_s22 + $0x10] sm:$0xff]  ;;  %s1169_s10 = sshll.u32 %s1838_s23, 3 }
  0x10   : > { %v1274_v9 = vld [vmem:[%s1460_s22 + $0x20] sm:$0xff]  ;;  %v1275_v13 = vld [vmem:[%s1460_s22 + $0x28] sm:$0xff]  ;;  %v1276_v17 = vld [vmem:[%s1460_s22 + $0x30] sm:$0xff]  ;;  %v737_v27 = vadd.s32 64, %v1478_v25  ;;  %v745_v28 = vadd.s32 128, %v1478_v25  ;;  %v753_v30 = vadd.s32 192, %v1478_v25  ;;  %v762_v34 = vadd.s32 %v1481_v26, %v1478_v25  ;;  %s336_s13 = scalar_lea.vmem %s1829_s5, %s1169_s10  ;;  %s343_s17 = scalar_lea.vmem %s1830_s6, %s1169_s10 }
  0x11   : > { %537 = vmatpush.bf16.msra.mxu0 %v1292_v1  ;;  %1297 = vmatpush.bf16.msra.mxu1 %v1292_v1  ;;  %v1278_v10 = vld [vmem:[%s1460_s22 + $0x40] sm:$0xff]  ;;  %v1279_v14 = vld [vmem:[%s1460_s22 + $0x48] sm:$0xff]  ;;  %v1280_v18 = vld [vmem:[%s1460_s22 + $0x50] sm:$0xff]  ;;  %v730_v31 = vadd.s32 8, %v1478_v25  ;;  %v738_v42 = vadd.s32 72, %v1478_v25  ;;  %v746_v44 = vadd.s32 136, %v1478_v25 }
  0x12   : > { %1298 = vmatpush.bf16.msra.mxu2 %v1292_v1  ;;  %1299 = vmatpush.bf16.msra.mxu3 %v1292_v1  ;;  %v1282_v11 = vld [vmem:[%s1460_s22 + $0x60] sm:$0xff]  ;;  %v1283_v15 = vld [vmem:[%s1460_s22 + $0x68] sm:$0xff]  ;;  %v1284_v19 = vld [vmem:[%s1460_s22 + $0x70] sm:$0xff]  ;;  %v770_v38 = vadd.s32 %v1481_v26, %v737_v27  ;;  %v778_v39 = vadd.s32 %v1481_v26, %v745_v28  ;;  %v1507_v40 = vadd.s32 %v1481_v26, %v753_v30  ;;  %v754_v45 = vadd.s32 200, %v1478_v25 }
  0x13   : > { %v1273_v20 = vld [vmem:[%s1460_s22 + $0x18] sm:$0xff]  ;;  %v1493_v32 = vld [vmem:[%s1827_s3] ss:$0 sm:$0xff]  ;;  %v1510_v41 = vadd.s32 %v1481_v26, %v730_v31  ;;  %vm794_vm0 = vcmp.lt.s32.totalorder %v762_v34, 512  ;;  %v731_v47 = vadd.s32 16, %v1478_v25  ;;  %v739_v48 = vadd.s32 80, %v1478_v25 }
  0x14   : > { %v1277_v21 = vld [vmem:[%s1460_s22 + $0x38] sm:$0xff]  ;;  %vm802_vm1 = vcmp.lt.s32.totalorder %v770_v38, 512  ;;  %vm810_vm2 = vcmp.lt.s32.totalorder %v778_v39, 512  ;;  %vm818_vm3 = vcmp.lt.s32.totalorder %v1507_v40, 512  ;;  %v771_v49 = vadd.s32 %v1481_v26, %v738_v42 }
  0x15   : > { %538 = vmatpush.bf16.msra.mxu0 %v1291_v2  ;;  %1300 = vmatpush.bf16.msra.mxu1 %v1291_v2  ;;  %v1281_v22 = vld [vmem:[%s1460_s22 + $0x58] sm:$0xff]  ;;  %vm795_vm4 = vcmp.lt.s32.totalorder %v1510_v41, 512  ;;  %v747_v50 = vadd.s32 144, %v1478_v25  ;;  %v1526_v55 = vadd.s32 %v1481_v26, %v746_v44  ;;  %v1529_v56 = vadd.s32 %v1481_v26, %v754_v45 }
  0x16   : > { %1301 = vmatpush.bf16.msra.mxu2 %v1291_v2  ;;  %1302 = vmatpush.bf16.msra.mxu3 %v1291_v2  ;;  %v1285_v23 = vld [vmem:[%s1460_s22 + $0x78] sm:$0xff]  ;;  %v1538_v1 = vadd.s32 %v1481_v26, %v731_v47  ;;  %v1541_v2 = vadd.s32 %v1481_v26, %v739_v48  ;;  %vm803_vm5 = vcmp.lt.s32.totalorder %v771_v49, 512 }
  0x17   : > { %vm811_vm6 = vcmp.lt.s32.totalorder %v1526_v55, 512  ;;  %vm819_vm7 = vcmp.lt.s32.totalorder %v1529_v56, 512 }
  0x18   : > { %vm796_vm8 = vcmp.lt.s32.totalorder %v1538_v1, 512  ;;  %vm804_vm9 = vcmp.lt.s32.totalorder %v1541_v2, 512 }
  0x19   : > { %539 = vmatpush.bf16.msra.mxu0 %v1290_v3  ;;  %1303 = vmatpush.bf16.msra.mxu1 %v1290_v3 }
  0x1a   : > { %1304 = vmatpush.bf16.msra.mxu2 %v1290_v3  ;;  %1305 = vmatpush.bf16.msra.mxu3 %v1290_v3 }
  0x1d   : > { %540 = vmatpush.bf16.msra.mxu0 %v1289_v4  ;;  %1306 = vmatpush.bf16.msra.mxu1 %v1289_v4 }
  0x1e   : > { %1307 = vmatpush.bf16.msra.mxu2 %v1289_v4  ;;  %1308 = vmatpush.bf16.msra.mxu3 %v1289_v4 }
  0x21   : > { %541 = vmatpush.bf16.msra.mxu0 %v1288_v5  ;;  %1309 = vmatpush.bf16.msra.mxu1 %v1288_v5 }
  0x22   : > { %1310 = vmatpush.bf16.msra.mxu2 %v1288_v5  ;;  %1311 = vmatpush.bf16.msra.mxu3 %v1288_v5  ;;  %v1548_v5 = vadd.s32 %v1481_v26, %v747_v50 }
  0x24   : > { %vm812_vm10 = vcmp.lt.s32.totalorder %v1548_v5, 512 }
  0x25   : > { %542 = vmatpush.bf16.msra.mxu0 %v1287_v6  ;;  %1312 = vmatpush.bf16.msra.mxu1 %v1287_v6 }
  0x26   : > { %1313 = vmatpush.bf16.msra.mxu2 %v1287_v6  ;;  %1314 = vmatpush.bf16.msra.mxu3 %v1287_v6  ;;  %v755_v6 = vadd.s32 208, %v1478_v25 }
  0x29   : > { %543 = vmatpush.bf16.msra.mxu0 %v1286_v7  ;;  %1315 = vmatpush.bf16.msra.mxu1 %v1286_v7 }
  0x2a   : > { %1316 = vmatpush.bf16.msra.mxu2 %v1286_v7  ;;  %1317 = vmatpush.bf16.msra.mxu3 %v1286_v7 }
  0x2c   : > { %544 = vmatmul.bf16.vlgmr.msra.gmra.mxu0 %v1270_v8  ;;  %564 = vmatmul.bf16.vlgmr.msra.gmra.mxu1 %v1274_v9 }
  0x2d   : > { %584 = vmatmul.bf16.vlgmr.msra.gmra.mxu2 %v1278_v10  ;;  %604 = vmatmul.bf16.vlgmr.msra.gmra.mxu3 %v1282_v11 }
  0x3c   : > { %549 = vmatmul.bf16.gmra.mxu0 %v1271_v12  ;;  %569 = vmatmul.bf16.gmra.mxu1 %v1275_v13 }
  0x3d   : > { %589 = vmatmul.bf16.gmra.mxu2 %v1279_v14  ;;  %609 = vmatmul.bf16.gmra.mxu3 %v1283_v15  ;;  %v732_v14 = vadd.s32 24, %v1478_v25 }
  0x4c   : > { %554 = vmatmul.bf16.gmra.mxu0 %v1272_v16  ;;  %574 = vmatmul.bf16.gmra.mxu1 %v1276_v17 }
  0x4d   : > { %594 = vmatmul.bf16.gmra.mxu2 %v1280_v18  ;;  %614 = vmatmul.bf16.gmra.mxu3 %v1284_v19  ;;  %v740_v18 = vadd.s32 88, %v1478_v25 }
  0x5c   : > { %559 = vmatmul.bf16.gmra.mxu0 %v1273_v20  ;;  %579 = vmatmul.bf16.gmra.mxu1 %v1277_v21 }
  0x5d   : > { %599 = vmatmul.bf16.gmra.mxu2 %v1281_v22  ;;  %619 = vmatmul.bf16.gmra.mxu3 %v1285_v23  ;;  %v1572_v23 = vadd.s32 %v1481_v26, %v755_v6 }
  0x5f   : > { %vm820_vm11 = vcmp.lt.s32.totalorder %v1572_v23, 512 }
  0xa9   : > { %v545_v33 = vpop.f32.mrf.mxu0  ;;  %v565_v35 = vpop.f32.mrf.mxu1 }
  0xaa   : > { %v627_v36 = vmul.f32 %v1485_v29, %v545_v33  ;;  %v635_v37 = vmul.f32 %v1485_v29, %v565_v35  ;;  %v1579_v33 = vadd.s32 %v1481_v26, %v732_v14 }
  0xac   : > { %v663_v43 = vadd.f32 %v1493_v32, %v627_v36  ;;  %v671_v46 = vadd.f32 %v1493_v32, %v635_v37  ;;  %v1585_v37 = vadd.s32 %v1481_v26, %v740_v18  ;;  %vm797_vm12 = vcmp.lt.s32.totalorder %v1579_v33, 512 }
  0xae   : > { %695 = vst [vmem:[%s1504_s9] sm:$0xff] %v663_v43  ;;  %v826_v51 = vsel %vm794_vm0, %v663_v43, inf  ;;  %v898_v52 = vsel %vm794_vm0, %v663_v43, -inf  ;;  %v834_v57 = vsel %vm802_vm1, %v671_v46, inf  ;;  %v906_v58 = vsel %vm802_vm1, %v671_v46, -inf }
  0xaf   : > { %703 = vst [vmem:[%s1504_s9 + $0x40] sm:$0xff] %v671_v46  ;;  %v858_v7 = vmin.f32 %v826_v51, %v834_v57  ;;  %v930_v8 = vmax.f32 %v898_v52, %v906_v58  ;;  %v748_v46 = vadd.s32 152, %v1478_v25  ;;  %v733_v57 = vadd.s32 32, %v1478_v25 }
  0xb0   : > { %v585_v53 = vpop.f32.mrf.mxu2  ;;  %v605_v54 = vpop.f32.mrf.mxu3  ;;  %v741_v58 = vadd.s32 96, %v1478_v25  ;;  %vm805_vm13 = vcmp.lt.s32.totalorder %v1585_v37, 512 }
  0xb1   : > { %v643_v59 = vmul.f32 %v1485_v29, %v585_v53  ;;  %v651_v60 = vmul.f32 %v1485_v29, %v605_v54  ;;  %v547_v61 = vpop.f32.mrf.mxu0  ;;  %v567_v62 = vpop.f32.mrf.mxu1  ;;  %v756_v54 = vadd.s32 216, %v1478_v25  ;;  %v766_v14 = vadd.s32 %v1481_v26, %v733_v57 }
  0xb2   : > { %v628_v63 = vmul.f32 %v1485_v29, %v547_v61  ;;  %v636_v0 = vmul.f32 %v1485_v29, %v567_v62 }
  0xb3   : > { %v679_v3 = vadd.f32 %v1493_v32, %v643_v59  ;;  %v1545_v4 = vadd.f32 %v1493_v32, %v651_v60  ;;  %vm798_vm0 = vcmp.lt.s32.totalorder %v766_v14, 512 }
  0xb4   : > { %v664_v9 = vadd.f32 %v1493_v32, %v628_v63  ;;  %v672_v10 = vadd.f32 %v1493_v32, %v636_v0  ;;  %v781_v63 = vadd.s32 %v1481_v26, %v748_v46 }
  0xb5   : > { %711 = vst [vmem:[%s1504_s9 + $0x80] sm:$0xff] %v679_v3  ;;  %v842_v11 = vsel %vm810_vm2, %v679_v3, inf  ;;  %v914_v12 = vsel %vm810_vm2, %v679_v3, -inf  ;;  %v922_v13 = vsel %vm818_vm3, %v1545_v4, -inf }
  0xb6   : > { %v862_v15 = vmin.f32 %v858_v7, %v842_v11  ;;  %v934_v16 = vmax.f32 %v930_v8, %v914_v12  ;;  %719 = vst [vmem:[%s1504_s9 + $0xc0] sm:$0xff] %v1545_v4  ;;  %v827_v17 = vsel %vm795_vm4, %v664_v9, inf  ;;  %v899_v24 = vsel %vm795_vm4, %v664_v9, -inf }
  0xb7   : > { %696 = vst [vmem:[%s1504_s9 + $0x8] sm:$0xff] %v664_v9  ;;  %v835_v38 = vsel %vm803_vm5, %v672_v10, inf  ;;  %v907_v39 = vsel %vm803_vm5, %v672_v10, -inf  ;;  %v1627_v12 = vadd.s32 %v1481_v26, %v756_v54  ;;  %vm813_vm14 = vcmp.lt.s32.totalorder %v781_v63, 512 }
  0xb8   : > { %v938_v19 = vmax.f32 %v934_v16, %v922_v13  ;;  %v866_v20 = vmin.f32 %v862_v15, %v827_v17  ;;  %704 = vst [vmem:[%s1504_s9 + $0x48] sm:$0xff] %v672_v10  ;;  %v587_v21 = vpop.f32.mrf.mxu2  ;;  %v607_v22 = vpop.f32.mrf.mxu3  ;;  %v1635_v15 = vadd.s32 %v1481_v26, %v741_v58  ;;  %v750_v63 = vadd.s32 168, %v1478_v25 }
  0xb9   : > { %v644_v27 = vmul.f32 %v1485_v29, %v587_v21  ;;  %v652_v28 = vmul.f32 %v1485_v29, %v607_v22  ;;  %v550_v30 = vpop.f32.mrf.mxu0  ;;  %v570_v31 = vpop.f32.mrf.mxu1  ;;  %vm821_vm15 = vcmp.lt.s32.totalorder %v1627_v12, 512 }
  0xba   : > { %v942_v34 = vmax.f32 %v938_v19, %v899_v24  ;;  %v629_v35 = vmul.f32 %v1485_v29, %v550_v30  ;;  %v637_v36 = vmul.f32 %v1485_v29, %v570_v31  ;;  %v859_v43 = vmin.f32 %v835_v38, %v866_v20 }
  0xbb   : > { %v680_v41 = vadd.f32 %v1493_v32, %v644_v27  ;;  %v1591_v42 = vadd.f32 %v1493_v32, %v652_v28  ;;  %v749_v24 = vadd.s32 160, %v1478_v25  ;;  %vm806_vm1 = vcmp.lt.s32.totalorder %v1635_v15, 512 }
  0xbc   : > { %v946_v44 = vmax.f32 %v942_v34, %v907_v39  ;;  %v665_v45 = vadd.f32 %v1493_v32, %v629_v35  ;;  %v673_v50 = vadd.f32 %v1493_v32, %v637_v36  ;;  %v783_v15 = vadd.s32 %v1481_v26, %v750_v63 }
  0xbd   : > { %712 = vst [vmem:[%s1504_s9 + $0x88] sm:$0xff] %v680_v41  ;;  %v843_v47 = vsel %vm811_vm6, %v680_v41, inf  ;;  %v915_v48 = vsel %vm811_vm6, %v680_v41, -inf  ;;  %v923_v49 = vsel %vm819_vm7, %v1591_v42, -inf }
  0xbe   : > { %v863_v51 = vmin.f32 %v859_v43, %v843_v47  ;;  %v931_v52 = vmax.f32 %v915_v48, %v946_v44  ;;  %720 = vst [vmem:[%s1504_s9 + $0xc8] sm:$0xff] %v1591_v42  ;;  %v828_v53 = vsel %vm796_vm8, %v665_v45, inf  ;;  %v900_v55 = vsel %vm796_vm8, %v665_v45, -inf }
  0xbf   : > { %697 = vst [vmem:[%s1504_s9 + $0x10] sm:$0xff] %v665_v45  ;;  %v836_v0 = vsel %vm804_vm9, %v673_v50, inf  ;;  %v908_v1 = vsel %vm804_vm9, %v673_v50, -inf  ;;  %v782_v44 = vadd.s32 %v1481_v26, %v749_v24  ;;  %v734_v48 = vadd.s32 40, %v1478_v25 }
  0xc0   : > { %v935_v59 = vmax.f32 %v931_v52, %v923_v49  ;;  %v867_v60 = vmin.f32 %v863_v51, %v828_v53  ;;  %705 = vst [vmem:[%s1504_s9 + $0x50] sm:$0xff] %v673_v50  ;;  %v590_v61 = vpop.f32.mrf.mxu2  ;;  %v610_v62 = vpop.f32.mrf.mxu3  ;;  %vm815_vm6 = vcmp.lt.s32.totalorder %v783_v15, 512 }
  0xc1   : > { %v645_v3 = vmul.f32 %v1485_v29, %v590_v61  ;;  %v653_v6 = vmul.f32 %v1485_v29, %v610_v62  ;;  %v552_v7 = vpop.f32.mrf.mxu0  ;;  %v572_v8 = vpop.f32.mrf.mxu1  ;;  %vm814_vm2 = vcmp.lt.s32.totalorder %v782_v44, 512 }
  0xc2   : > { %v939_v9 = vmax.f32 %v935_v59, %v900_v55  ;;  %v630_v10 = vmul.f32 %v1485_v29, %v552_v7  ;;  %v638_v11 = vmul.f32 %v1485_v29, %v572_v8  ;;  %v860_v16 = vmin.f32 %v836_v0, %v867_v60 }
  0xc3   : > { %v681_v13 = vadd.f32 %v1493_v32, %v645_v3  ;;  %v1631_v2 = vadd.f32 %v1493_v32, %v653_v6  ;;  %v742_v55 = vadd.s32 104, %v1478_v25  ;;  %v767_v0 = vadd.s32 %v1481_v26, %v734_v48 }
  0xc4   : > { %v943_v17 = vmax.f32 %v939_v9, %v908_v1  ;;  %v666_v18 = vadd.f32 %v1493_v32, %v630_v10  ;;  %v674_v19 = vadd.f32 %v1493_v32, %v638_v11  ;;  %v735_v3 = vadd.s32 48, %v1478_v25 }
  0xc5   : > { %713 = vst [vmem:[%s1504_s9 + $0x90] sm:$0xff] %v681_v13  ;;  %v844_v20 = vsel %vm812_vm10, %v681_v13, inf  ;;  %v916_v21 = vsel %vm812_vm10, %v681_v13, -inf  ;;  %v924_v22 = vsel %vm820_vm11, %v1631_v2, -inf  ;;  %v775_v10 = vadd.s32 %v1481_v26, %v742_v55 }
  0xc6   : > { %v864_v27 = vmin.f32 %v860_v16, %v844_v20  ;;  %v947_v28 = vmax.f32 %v943_v17, %v916_v21  ;;  %721 = vst [vmem:[%s1504_s9 + $0xd0] sm:$0xff] %v1631_v2  ;;  %v829_v30 = vsel %vm797_vm12, %v666_v18, inf  ;;  %v901_v36 = vsel %vm797_vm12, %v666_v18, -inf }
  0xc7   : > { %698 = vst [vmem:[%s1504_s9 + $0x18] sm:$0xff] %v666_v18  ;;  %v837_v33 = vsel %vm805_vm13, %v674_v19, inf  ;;  %v909_v49 = vsel %vm805_vm13, %v674_v19, -inf  ;;  %vm799_vm4 = vcmp.lt.s32.totalorder %v767_v0, 512  ;;  %vm807_vm5 = vcmp.lt.s32.totalorder %v775_v10, 512 }
  0xc8   : > { %v932_v5 = vmax.f32 %v924_v22, %v947_v28  ;;  %v868_v31 = vmin.f32 %v864_v27, %v829_v30  ;;  %706 = vst [vmem:[%s1504_s9 + $0x58] sm:$0xff] %v674_v19  ;;  %v592_v34 = vpop.f32.mrf.mxu2  ;;  %v612_v35 = vpop.f32.mrf.mxu3  ;;  %v768_v27 = vadd.s32 %v1481_v26, %v735_v3  ;;  %v852_v40 = vsel %vm820_vm11, %v1631_v2, inf }
  0xc9   : > { %v646_v38 = vmul.f32 %v1485_v29, %v592_v34  ;;  %v654_v39 = vmul.f32 %v1485_v29, %v612_v35  ;;  %v555_v41 = vpop.f32.mrf.mxu0  ;;  %v575_v43 = vpop.f32.mrf.mxu1 }
  0xca   : > { %v936_v45 = vmax.f32 %v932_v5, %v901_v36  ;;  %v631_v46 = vmul.f32 %v1485_v29, %v555_v41  ;;  %v639_v47 = vmul.f32 %v1485_v29, %v575_v43  ;;  %v861_v52 = vmin.f32 %v837_v33, %v868_v31 }
  0xcb   : > { %v682_v50 = vadd.f32 %v1493_v32, %v646_v38  ;;  %v1671_v51 = vadd.f32 %v1493_v32, %v654_v39  ;;  %v743_v36 = vadd.s32 112, %v1478_v25  ;;  %v751_v38 = vadd.s32 176, %v1478_v25 }
  0xcc   : > { %v940_v53 = vmax.f32 %v936_v45, %v909_v49  ;;  %v667_v54 = vadd.f32 %v1493_v32, %v631_v46  ;;  %v675_v59 = vadd.f32 %v1493_v32, %v639_v47  ;;  %vm800_vm8 = vcmp.lt.s32.totalorder %v768_v27, 512 }
  0xcd   : > { %714 = vst [vmem:[%s1504_s9 + $0x98] sm:$0xff] %v682_v50  ;;  %v845_v57 = vsel %vm813_vm14, %v682_v50, inf  ;;  %v917_v58 = vsel %vm813_vm14, %v682_v50, -inf  ;;  %v925_v37 = vsel %vm821_vm15, %v1671_v51, -inf  ;;  %v853_v56 = vsel %vm821_vm15, %v1671_v51, inf }
  0xce   : > { %v865_v60 = vmin.f32 %v861_v52, %v845_v57  ;;  %v944_v61 = vmax.f32 %v940_v53, %v917_v58  ;;  %722 = vst [vmem:[%s1504_s9 + $0xd8] sm:$0xff] %v1671_v51  ;;  %v830_v62 = vsel %vm798_vm0, %v667_v54, inf  ;;  %v902_v1 = vsel %vm798_vm0, %v667_v54, -inf }
  0xcf   : > { %699 = vst [vmem:[%s1504_s9 + $0x20] sm:$0xff] %v667_v54  ;;  %v838_v11 = vsel %vm806_vm1, %v675_v59, inf  ;;  %v910_v13 = vsel %vm806_vm1, %v675_v59, -inf  ;;  %v776_v53 = vadd.s32 %v1481_v26, %v743_v36  ;;  %v736_v54 = vadd.s32 56, %v1478_v25 }
  0xd0   : > { %v948_v6 = vmax.f32 %v944_v61, %v925_v37  ;;  %v869_v7 = vmin.f32 %v865_v60, %v830_v62  ;;  %707 = vst [vmem:[%s1504_s9 + $0x60] sm:$0xff] %v675_v59  ;;  %v595_v8 = vpop.f32.mrf.mxu2  ;;  %v615_v9 = vpop.f32.mrf.mxu3  ;;  %v784_v58 = vadd.s32 %v1481_v26, %v751_v38 }
  0xd1   : > { %v647_v14 = vmul.f32 %v1485_v29, %v595_v8  ;;  %v655_v16 = vmul.f32 %v1485_v29, %v615_v9  ;;  %v557_v17 = vpop.f32.mrf.mxu0  ;;  %v577_v18 = vpop.f32.mrf.mxu1  ;;  %vm808_vm9 = vcmp.lt.s32.totalorder %v776_v53, 512 }
  0xd2   : > { %v933_v19 = vmax.f32 %v902_v1, %v948_v6  ;;  %v632_v20 = vmul.f32 %v1485_v29, %v557_v17  ;;  %v640_v21 = vmul.f32 %v1485_v29, %v577_v18  ;;  %v870_v28 = vmin.f32 %v838_v11, %v869_v7 }
  0xd3   : > { %v683_v22 = vadd.f32 %v1493_v32, %v647_v14  ;;  %v1702_v24 = vadd.f32 %v1493_v32, %v655_v16  ;;  %v769_v7 = vadd.s32 %v1481_v26, %v736_v54  ;;  %v752_v14 = vadd.s32 184, %v1478_v25 }
  0xd4   : > { %v937_v30 = vmax.f32 %v933_v19, %v910_v13  ;;  %v668_v5 = vadd.f32 %v1493_v32, %v632_v20  ;;  %v676_v31 = vadd.f32 %v1493_v32, %v640_v21  ;;  %v744_v13 = vadd.s32 120, %v1478_v25 }
  0xd5   : > { %715 = vst [vmem:[%s1504_s9 + $0xa0] sm:$0xff] %v683_v22  ;;  %v846_v34 = vsel %vm814_vm2, %v683_v22, inf  ;;  %v918_v35 = vsel %vm814_vm2, %v683_v22, -inf  ;;  %vm816_vm10 = vcmp.lt.s32.totalorder %v784_v58, 512  ;;  %vm801_vm12 = vcmp.lt.s32.totalorder %v769_v7, 512 }
  0xd6   : > { %v871_v39 = vmin.f32 %v846_v34, %v870_v28  ;;  %v941_v41 = vmax.f32 %v937_v30, %v918_v35  ;;  %723 = vst [vmem:[%s1504_s9 + $0xe0] sm:$0xff] %v1702_v24  ;;  %v831_v43 = vsel %vm799_vm4, %v668_v5, inf  ;;  %v903_v45 = vsel %vm799_vm4, %v668_v5, -inf }
  0xd7   : > { %700 = vst [vmem:[%s1504_s9 + $0x28] sm:$0xff] %v668_v5  ;;  %v839_v37 = vsel %vm807_vm5, %v676_v31, inf  ;;  %v911_v59 = vsel %vm807_vm5, %v676_v31, -inf  ;;  %v777_v36 = vadd.s32 %v1481_v26, %v744_v13  ;;  %v785_v38 = vadd.s32 %v1481_v26, %v752_v14 }
  0xd8   : > { %v872_v46 = vmin.f32 %v831_v43, %v871_v39  ;;  %v945_v47 = vmax.f32 %v941_v41, %v903_v45  ;;  %708 = vst [vmem:[%s1504_s9 + $0x68] sm:$0xff] %v676_v31  ;;  %v597_v48 = vpop.f32.mrf.mxu2  ;;  %v617_v44 = vpop.f32.mrf.mxu3  ;;  %v757_v31 = vadd.s32 224, %v1478_v25  ;;  %v760_v58 = vadd.s32 248, %v1478_v25 }
  0xd9   : > { %v648_v33 = vmul.f32 %v1485_v29, %v597_v48  ;;  %v656_v49 = vmul.f32 %v1485_v29, %v617_v44  ;;  %v560_v50 = vpop.f32.mrf.mxu0  ;;  %v580_v52 = vpop.f32.mrf.mxu1  ;;  %v758_v48 = vadd.s32 232, %v1478_v25  ;;  %v759_v44 = vadd.s32 240, %v1478_v25 }
  0xda   : > { %v633_v55 = vmul.f32 %v1485_v29, %v560_v50  ;;  %v641_v57 = vmul.f32 %v1485_v29, %v580_v52  ;;  %v873_v62 = vmin.f32 %v839_v37, %v872_v46  ;;  %v949_v0 = vmax.f32 %v945_v47, %v911_v59 }
  0xdb   : > { %v684_v60 = vadd.f32 %v1493_v32, %v648_v33  ;;  %v1728_v61 = vadd.f32 %v1493_v32, %v656_v49  ;;  %vm809_vm13 = vcmp.lt.s32.totalorder %v777_v36, 512  ;;  %v790_v37 = vadd.s32 %v1481_v26, %v757_v31 }
  0xdc   : > { %v669_v1 = vadd.f32 %v1493_v32, %v633_v55  ;;  %v677_v63 = vadd.f32 %v1493_v32, %v641_v57  ;;  %vm817_vm14 = vcmp.lt.s32.totalorder %v785_v38, 512  ;;  %v850_v13 = vsel %vm818_vm3, %v1545_v4, inf }
  0xdd   : > { %716 = vst [vmem:[%s1504_s9 + $0xa8] sm:$0xff] %v684_v60  ;;  %v847_v3 = vsel %vm815_vm6, %v684_v60, inf  ;;  %v919_v6 = vsel %vm815_vm6, %v684_v60, -inf  ;;  %vm822_vm0 = vcmp.lt.s32.totalorder %v790_v37, 512 }
  0xde   : > { %v874_v8 = vmin.f32 %v847_v3, %v873_v62  ;;  %v950_v9 = vmax.f32 %v919_v6, %v949_v0  ;;  %724 = vst [vmem:[%s1504_s9 + $0xe8] sm:$0xff] %v1728_v61  ;;  %v832_v10 = vsel %vm800_vm8, %v669_v1, inf  ;;  %v904_v11 = vsel %vm800_vm8, %v669_v1, -inf }
  0xdf   : > { %701 = vst [vmem:[%s1504_s9 + $0x30] sm:$0xff] %v669_v1  ;;  %v840_v18 = vsel %vm808_vm9, %v677_v63, inf  ;;  %v912_v21 = vsel %vm808_vm9, %v677_v63, -inf  ;;  %v791_v62 = vadd.s32 %v1481_v26, %v758_v48  ;;  %v792_v0 = vadd.s32 %v1481_v26, %v759_v44 }
  0xe0   : > { %v875_v16 = vmin.f32 %v832_v10, %v874_v8  ;;  %v951_v17 = vmax.f32 %v904_v11, %v950_v9  ;;  %709 = vst [vmem:[%s1504_s9 + $0x70] sm:$0xff] %v677_v63  ;;  %v600_v19 = vpop.f32.mrf.mxu2  ;;  %v620_v20 = vpop.f32.mrf.mxu3  ;;  %v793_v8 = vadd.s32 %v1481_v26, %v760_v58  ;;  %v851_v26 = vsel %vm819_vm7, %v1591_v42, inf }
  0xe1   : > { %v649_v22 = vmul.f32 %v1485_v29, %v600_v19  ;;  %v657_v15 = vmul.f32 %v1485_v29, %v620_v20  ;;  %v562_v27 = vpop.f32.mrf.mxu0  ;;  %v582_v28 = vpop.f32.mrf.mxu1  ;;  %vm823_vm1 = vcmp.lt.s32.totalorder %v791_v62, 512  ;;  %vm824_vm2 = vcmp.lt.s32.totalorder %v792_v0, 512 }
  0xe2   : > { %v634_v30 = vmul.f32 %v1485_v29, %v562_v27  ;;  %v642_v5 = vmul.f32 %v1485_v29, %v582_v28  ;;  %v876_v34 = vmin.f32 %v840_v18, %v875_v16  ;;  %v952_v39 = vmax.f32 %v912_v21, %v951_v17 }
  0xe3   : > { %v685_v35 = vadd.f32 %v1493_v32, %v649_v22  ;;  %v1755_v41 = vadd.f32 %v1493_v32, %v657_v15  ;;  %vm825_vm4 = vcmp.lt.s32.totalorder %v793_v8, 512  ;;  %v927_v17 = vsel %vm823_vm1, %v1728_v61, -inf }
  0xe4   : > { %v670_v43 = vadd.f32 %v1493_v32, %v634_v30  ;;  %v678_v45 = vadd.f32 %v1493_v32, %v642_v5  ;;  %v854_v27 = vsel %vm822_vm0, %v1702_v24, inf  ;;  %v855_v30 = vsel %vm823_vm1, %v1728_v61, inf }
  0xe5   : > { %717 = vst [vmem:[%s1504_s9 + $0xb0] sm:$0xff] %v685_v35  ;;  %v848_v46 = vsel %vm816_vm10, %v685_v35, inf  ;;  %v920_v47 = vsel %vm816_vm10, %v685_v35, -inf  ;;  %v928_v18 = vsel %vm824_vm2, %v1755_v41, -inf  ;;  %v856_v23 = vsel %vm824_vm2, %v1755_v41, inf }
  0xe6   : > { %v877_v33 = vmin.f32 %v848_v46, %v876_v34  ;;  %v953_v49 = vmax.f32 %v920_v47, %v952_v39  ;;  %725 = vst [vmem:[%s1504_s9 + $0xf0] sm:$0xff] %v1755_v41  ;;  %v833_v50 = vsel %vm801_vm12, %v670_v43, inf  ;;  %v905_v52 = vsel %vm801_vm12, %v670_v43, -inf }
  0xe7   : > { %702 = vst [vmem:[%s1504_s9 + $0x38] sm:$0xff] %v670_v43  ;;  %v841_v1 = vsel %vm809_vm13, %v678_v45, inf  ;;  %v913_v63 = vsel %vm809_vm13, %v678_v45, -inf }
  0xe8   : > { %v878_v53 = vmin.f32 %v833_v50, %v877_v33  ;;  %v954_v54 = vmax.f32 %v905_v52, %v953_v49  ;;  %710 = vst [vmem:[%s1504_s9 + $0x78] sm:$0xff] %v678_v45  ;;  %v602_v55 = vpop.f32.mrf.mxu2  ;;  %v622_v57 = vpop.f32.mrf.mxu3 }
  0xe9   : > { %v650_v59 = vmul.f32 %v1485_v29, %v602_v55  ;;  %v658_v60 = vmul.f32 %v1485_v29, %v622_v57 }
  0xea   : > { %v879_v7 = vmin.f32 %v841_v1, %v878_v53  ;;  %v955_v25 = vmax.f32 %v913_v63, %v954_v54 }
  0xeb   : > { %v686_v3 = vadd.f32 %v1493_v32, %v650_v59  ;;  %v694_v6 = vadd.f32 %v1493_v32, %v658_v60  ;;  %v926_v32 = vsel %vm822_vm0, %v1702_v24, -inf }
  0xed   : > { %718 = vst [vmem:[%s1504_s9 + $0xb8] sm:$0xff] %v686_v3  ;;  %v849_v9 = vsel %vm817_vm14, %v686_v3, inf  ;;  %v921_v29 = vsel %vm817_vm14, %v686_v3, -inf  ;;  %v929_v4 = vsel %vm825_vm4, %v694_v6, -inf  ;;  %v857_v31 = vsel %vm825_vm4, %v694_v6, inf }
  0xee   : > { %v880_v10 = vmin.f32 %v849_v9, %v879_v7  ;;  %v956_v11 = vmax.f32 %v921_v29, %v955_v25  ;;  %726 = vst [vmem:[%s1504_s9 + $0xf8] sm:$0xff] %v694_v6 }
  0xf0   : > { %v881_v14 = vmin.f32 %v850_v13, %v880_v10  ;;  %v957_v16 = vmax.f32 %v926_v32, %v956_v11 }
  0xf2   : > { %v882_v19 = vmin.f32 %v851_v26, %v881_v14  ;;  %v958_v20 = vmax.f32 %v927_v17, %v957_v16 }
  0xf4   : > { %v883_v21 = vmin.f32 %v852_v40, %v882_v19  ;;  %v959_v22 = vmax.f32 %v928_v18, %v958_v20 }
  0xf6   : > { %v884_v42 = vmin.f32 %v853_v56, %v883_v21  ;;  %v960_v15 = vmax.f32 %v929_v4, %v959_v22 }
  0xf8   : > { %v885_v28 = vmin.f32 %v854_v27, %v884_v42 }
  0xfa   : > { %v886_v5 = vmin.f32 %v855_v30, %v885_v28 }
  0xfc   : > { %v887_v2 = vmin.f32 %v856_v23, %v886_v5 }
  0xfe   : > { %v888_v34 = vmin.f32 %v857_v31, %v887_v2 }
 0x100   : > { %889 = vmin.xlane.f32.xlu0 %v888_v34 }
 0x108   : > { %961 = vmax.xlane.f32.xlu0 %v960_v15 }
 0x173   : > { %v890_v12 = vpop.xlane.xlu0 %889 }
 0x174   : > { %v891_v51 = vrot.slane %v890_v12, 4 }
 0x176   : > { %v892_v35 = vmin.f32 %v890_v12, %v891_v51 }
 0x178   : > { %v893_v24 = vrot.slane %v892_v35, 2 }
 0x17a   : > { %v894_v36 = vmin.f32 %v892_v35, %v893_v24 }
 0x17b   : > { %v962_v38 = vpop.xlane.xlu0 %961 }
 0x17c   : > { %v963_v39 = vrot.slane %v962_v38, 4  ;;  %v895_v61 = vrot.slane %v894_v36, 1 }
 0x17e   : > { %v964_v43 = vmax.f32 %v962_v38, %v963_v39  ;;  %v896_v45 = vmin.f32 %v894_v36, %v895_v61 }
 0x180   : > { %v965_v46 = vrot.slane %v964_v43, 2  ;;  %1318 = vpush %v896_v45 }
 0x182   : > { %v966_v41 = vmax.f32 %v964_v43, %v965_v46 }
 0x184   : > { %v967_v47 = vrot.slane %v966_v41, 1 }
 0x186   : > { %v968_v48 = vmax.f32 %v966_v41, %v967_v47 }
 0x188   : > { %1320 = vpush %v968_v48 }
 0x1b1   : > { %s1319_s14 = spop %1318 }
 0x1b2   : > { %v970_v44 = vstv %s1319_s14 }
 0x1b3   : > { %971 = vst [vmem:[%s336_s13] sm:$0xff] %v970_v44 }
 0x1b9   : > { %s1321_s18 = spop %1320 }
 0x1ba   : > { %v972_v33 = vstv %s1321_s18 }
 0x1bb   : > { %973 = vst [vmem:[%s343_s17] sm:$0xff] %v972_v33 }
 0x1bc PF: > { %s18_s25 = sadd.s32 1, %s1369_s25   ;;  %s1831_s23 = smov %s1365_s24 }
 0x1bd   : > { %p15_p6 = scmp.ge.s32.totalorder %s18_s25, 4   ;;  %s1832_s24 = smov %s1834_s0 }
 0x1bf   :  { %17 = sbr.rel (!%p15_p6) target bundleno = 2 (0x2), region = 96 }

// kernel: qconv2d_forward.7
= control target key start
LH: loop header
LB: loop body
LE: loop exit
PB: predicated region body
PF: predicated region fallthrough
CT: control target
= control target key end

     0   :  { %7 = vsyncpa [#allocation3], 0  ;;  %s889_s9 = smov 0   ;;  %s1392_s0 = inlined_call_operand.vmem [shape: f32[3], index: 0, kind: input, shape index: {}]   ;;  %s1393_s1 = inlined_call_operand.vmem [shape: f32[512,128], index: 1, kind: input, shape index: {}]   ;;  %s1394_s2 = inlined_call_operand.vmem [shape: f32[2,8,256], index: 2, kind: output, shape index: {}]  }
   0x1 LB: > { %s895_s10 = sadd.s32 4294967295, %s871_s9   ;;  %p557_p0 = scmp.ge.s32.totalorder %s871_s9, 1  ;;  %s871_s9 = sphi %s889_s9, %s13_s9  }
   0x2   : > { %p91_p1 = scmp.lt.s32.totalorder %s871_s9, 3  ;;  %s103_s13 = sshll.u32 %s1392_s0, 4  ;;  %s104_s13 = int_to_ptr.vmem [resolvable:$true] %s103_s13 }
   0x3   : > { %p835_p3 = scmp.eq.s32.totalorder %s895_s10, 0  ;;  %s873_s14 = smov [#allocation2]  }
   0x4   : > { %p92_p2 = pnand %p557_p0, %p91_p1 }
   0x6   : > { %p831_p4 = pneg %p92_p2  ;;  %125 = sbr.rel (%p92_p2) target bundleno = 209 (0xd1), region = 28 }
   0x8   : > { %p832_p5 = pnand %p835_p3, %p831_p4 }
   0xa   : > { %834 = dma.vmem_to_smem (!%p832_p5), %s104_s13, 16, %s873_s14, [#allocation3]  }
   0xb   : > { %866 = dma.done.wait (%p835_p3), [#allocation3], 16  }
   0xc   : > { %868 = vsyncadd (%p835_p3), [#allocation3], 4294967280 }
   0xd   : > { %132 = sfence }
   0xe   : > { %s562_s15 = sshll.u32 %s895_s10, 5  ;;  %s160_s16 = sld [smem:[#allocation2]] }
   0xf   : > { %p150_p6 = scmp.lt.s32.totalorder %s562_s15, 63  ;;  %s567_s17 = sld [smem:[#allocation2 + $0x2]] }
  0x10   : > { %s909_s22 = sld [smem:[#allocation2 + $0x1]]  ;;  %p155_p7 = scmp.lt.s32.totalorder %s895_s10, 1 }
  0x11   : > { %s1452_s15 = smov (!%p150_p6, %s562_s15), 63 }
  0x12   : > { %s563_s18 = sshll.u32 %s1452_s15, 3  ;;  %s1454_s10 = smov (!%p155_p7, %s895_s10), 1 }
  0x13   : > { %s907_s21 = scalar_lea.vmem %s1393_s1, %s563_s18  ;;  %s570_s23 = sshll.u32 %s1454_s10, 4 }
  0x14   : > { %v911_v0 = vstv %s160_s16  ;;  %v179_v1 = vld [vmem:[%s907_s21 + $0x80] sm:$0xff]  ;;  %v180_v3 = vld [vmem:[%s907_s21 + $0x88] sm:$0xff]  ;;  %v181_v9 = vld [vmem:[%s907_s21 + $0x90] sm:$0xff]  ;;  %s159_s26 = scalar_lea.vmem %s1394_s2, %s570_s23 }
  0x15   : > { %v163_v2 = vld [vmem:[%s907_s21] sm:$0xff]  ;;  %v212_v4 = vmul.f32 %v911_v0, %v179_v1  ;;  %v917_v5 = vstv %s567_s17  ;;  %v213_v7 = vmul.f32 %v911_v0, %v180_v3  ;;  %v164_v8 = vld [vmem:[%s907_s21 + $0x8] sm:$0xff]  ;;  %v165_v10 = vld [vmem:[%s907_s21 + $0x10] sm:$0xff]  ;;  %v214_v12 = vmul.f32 %v911_v0, %v181_v9 }
  0x16   : > { %v196_v6 = vmul.f32 %v911_v0, %v163_v2  ;;  %v197_v11 = vmul.f32 %v911_v0, %v164_v8  ;;  %v198_v13 = vmul.f32 %v911_v0, %v165_v10  ;;  %v182_v14 = vld [vmem:[%s907_s21 + $0x98] sm:$0xff]  ;;  %v940_v33 = vstv %s909_s22  ;;  %v185_v50 = vld [vmem:[%s907_s21 + $0xb0] sm:$0xff] }
  0x17   : > { %v166_v15 = vld [vmem:[%s907_s21 + $0x18] sm:$0xff]  ;;  %v245_v16 = vadd.f32 %v917_v5, %v212_v4  ;;  %v246_v18 = vadd.f32 %v917_v5, %v213_v7  ;;  %v215_v19 = vmul.f32 %v911_v0, %v182_v14  ;;  %v247_v21 = vadd.f32 %v917_v5, %v214_v12 }
  0x18   : > { %v229_v17 = vadd.f32 %v917_v5, %v196_v6  ;;  %v230_v20 = vadd.f32 %v917_v5, %v197_v11  ;;  %v231_v22 = vadd.f32 %v917_v5, %v198_v13  ;;  %v199_v23 = vmul.f32 %v911_v0, %v166_v15 }
  0x19   : > { %v277_v24 = vmax.f32 %v245_v16, 0.0  ;;  %v278_v26 = vmax.f32 %v246_v18, 0.0  ;;  %v248_v27 = vadd.f32 %v917_v5, %v215_v19  ;;  %v279_v29 = vmax.f32 %v247_v21, 0.0 }
  0x1a   : > { %v261_v25 = vmax.f32 %v229_v17, 0.0  ;;  %v262_v28 = vmax.f32 %v230_v20, 0.0  ;;  %v263_v30 = vmax.f32 %v231_v22, 0.0  ;;  %v232_v31 = vadd.f32 %v917_v5, %v199_v23 }
  0x1b   : > { %v309_v32 = vmin.f32 %v277_v24, 255.0  ;;  %v310_v35 = vmin.f32 %v278_v26, 255.0  ;;  %v942_v37 = vmin.f32 %v279_v29, 255.0  ;;  %v280_v39 = vmax.f32 %v248_v27, 0.0 }
  0x1c   : > { %v293_v34 = vmin.f32 %v261_v25, 255.0  ;;  %v294_v36 = vmin.f32 %v262_v28, 255.0  ;;  %v944_v38 = vmin.f32 %v263_v30, 255.0  ;;  %v264_v43 = vmax.f32 %v232_v31, 0.0 }
  0x1d   : > { %v699_v40 = vand.u32 2147483647, %v309_v32  ;;  %v701_v41 = vcvt.f32.s32 %v309_v32  ;;  %v704_v44 = vand.u32 2147483648, %v309_v32  ;;  %v707_v46 = vand.u32 2147483647, %v310_v35 }
  0x1e   : > { %v571_v42 = vand.u32 2147483647, %v293_v34  ;;  %v573_v45 = vcvt.f32.s32 %v293_v34  ;;  %v709_v47 = vcvt.f32.s32 %v310_v35  ;;  %v576_v51 = vand.u32 2147483648, %v293_v34 }
  0x1f   : > { %vm946_vm0 = vcmp.lt.f32.partialorder %v699_v40, 8388608.0  ;;  %v702_v49 = vcvt.s32.f32 %v701_v41  ;;  %v712_v54 = vand.u32 2147483648, %v310_v35  ;;  %v579_v55 = vand.u32 2147483647, %v294_v36  ;;  %v167_v40 = vld [vmem:[%s907_s21 + $0x20] sm:$0xff] }
  0x20   : > { %vm950_vm1 = vcmp.lt.f32.partialorder %v571_v42, 8388608.0  ;;  %v574_v52 = vcvt.s32.f32 %v573_v45  ;;  %v710_v53 = vcvt.s32.f32 %v709_v47  ;;  %vm954_vm2 = vcmp.lt.f32.partialorder %v707_v46, 8388608.0  ;;  %v168_v45 = vld [vmem:[%s907_s21 + $0x28] sm:$0xff] }
  0x21   : > { %v703_v56 = vand.u32 2147483647, %v702_v49  ;;  %v581_v58 = vcvt.f32.s32 %v294_v36  ;;  %v715_v59 = vand.u32 2147483647, %v942_v37  ;;  %v584_v62 = vand.u32 2147483648, %v294_v36 }
  0x22   : > { %v575_v60 = vand.u32 2147483647, %v574_v52  ;;  %v711_v61 = vand.u32 2147483647, %v710_v53  ;;  %v717_v63 = vcvt.f32.s32 %v942_v37  ;;  %vm960_vm3 = vcmp.lt.f32.partialorder %v579_v55, 8388608.0 }
  0x23   : > { %v705_v1 = vor.u32 %v704_v44, %v703_v56  ;;  %v582_v3 = vcvt.s32.f32 %v581_v58  ;;  %vm964_vm4 = vcmp.lt.f32.partialorder %v715_v59, 8388608.0  ;;  %v720_v9 = vand.u32 2147483648, %v942_v37 }
  0x24   : > { %v577_v6 = vor.u32 %v576_v51, %v575_v60  ;;  %v713_v7 = vor.u32 %v712_v54, %v711_v61  ;;  %v718_v8 = vcvt.s32.f32 %v717_v63  ;;  %v587_v12 = vand.u32 2147483647, %v944_v38 }
  0x25   : > { %v706_v10 = vsel %vm946_vm0, %v705_v1, %v309_v32  ;;  %v583_v11 = vand.u32 2147483647, %v582_v3  ;;  %v589_v13 = vcvt.f32.s32 %v944_v38  ;;  %v592_v21 = vand.u32 2147483648, %v944_v38 }
  0x26   : > { %v373_v14 = vsub.f32 %v706_v10, %v917_v5  ;;  %v578_v15 = vsel %vm950_vm1, %v577_v6, %v293_v34  ;;  %v714_v16 = vsel %vm954_vm2, %v713_v7, %v310_v35  ;;  %v719_v17 = vand.u32 2147483647, %v718_v8 }
  0x27   : > { %v357_v18 = vsub.f32 %v578_v15, %v917_v5  ;;  %v374_v19 = vsub.f32 %v714_v16, %v917_v5  ;;  %v585_v20 = vor.u32 %v584_v62, %v583_v11  ;;  %v590_v24 = vcvt.s32.f32 %v589_v13 }
  0x28   : > { %v406_v22 = vmul.f32 %v940_v33, %v373_v14  ;;  %v721_v23 = vor.u32 %v720_v9, %v719_v17  ;;  %v312_v25 = vmin.f32 %v280_v39, 255.0  ;;  %v985_v28 = vmin.f32 %v264_v43, 255.0  ;;  %v183_v39 = vld [vmem:[%s907_s21 + $0xa0] sm:$0xff]  ;;  %v169_v14 = vld [vmem:[%s907_s21 + $0x30] sm:$0xff] }
  0x29   : > { %v390_v26 = vmul.f32 %v940_v33, %v357_v18  ;;  %v586_v27 = vsel %vm960_vm3, %v585_v20, %v294_v36  ;;  %v591_v31 = vand.u32 2147483647, %v590_v24  ;;  %v407_v34 = vmul.f32 %v940_v33, %v374_v19 }
  0x2a   : > { %454 = vxpose.xlu1.b32.start [1/16] (narrow) %v406_v22, 8  ;;  %v358_v29 = vsub.f32 %v586_v27, %v917_v5  ;;  %v722_v30 = vsel %vm964_vm4, %v721_v23, %v942_v37  ;;  %v723_v32 = vand.u32 2147483647, %v312_v25  ;;  %vm992_vm5 = vcmp.lt.f32.partialorder %v587_v12, 8388608.0  ;;  %v184_v37 = vld [vmem:[%s907_s21 + $0xa8] sm:$0xff] }
  0x2b   : > { %422 = vxpose.xlu0.b32.start [1/16] (narrow) %v390_v26, 8  ;;  %v725_v36 = vcvt.f32.s32 %v312_v25  ;;  %v375_v41 = vsub.f32 %v722_v30, %v917_v5  ;;  %v593_v42 = vor.u32 %v592_v21, %v591_v31  ;;  %v728_v43 = vand.u32 2147483648, %v312_v25 }
  0x2c   : > { %v597_v44 = vcvt.f32.s32 %v985_v28  ;;  %v391_v46 = vmul.f32 %v940_v33, %v358_v29  ;;  %vm1003_vm6 = vcmp.lt.f32.partialorder %v723_v32, 8388608.0  ;;  %v595_v49 = vand.u32 2147483647, %v985_v28 }
  0x2d   : > { %v726_v48 = vcvt.s32.f32 %v725_v36  ;;  %v600_v52 = vand.u32 2147483648, %v985_v28  ;;  %v216_v53 = vmul.f32 %v911_v0, %v183_v39  ;;  %v200_v54 = vmul.f32 %v911_v0, %v167_v40 }
  0x2e   : > { %v598_v51 = vcvt.s32.f32 %v597_v44  ;;  %v594_v55 = vsel %vm992_vm5, %v593_v42, %v944_v38  ;;  %v217_v57 = vmul.f32 %v911_v0, %v184_v37  ;;  %v201_v58 = vmul.f32 %v911_v0, %v168_v45 }
  0x2f   : > { %v727_v56 = vand.u32 2147483647, %v726_v48  ;;  %v249_v60 = vadd.f32 %v917_v5, %v216_v53  ;;  %v233_v61 = vadd.f32 %v917_v5, %v200_v54  ;;  %v218_v62 = vmul.f32 %v911_v0, %v185_v50 }
  0x30   : > { %v599_v59 = vand.u32 2147483647, %v598_v51  ;;  %vm1020_vm7 = vcmp.lt.f32.partialorder %v595_v49, 8388608.0  ;;  %v250_v38 = vadd.f32 %v917_v5, %v217_v57  ;;  %v234_v2 = vadd.f32 %v917_v5, %v201_v58  ;;  %v186_v57 = vld [vmem:[%s907_s21 + $0xb8] sm:$0xff] }
  0x31   : > { %v729_v63 = vor.u32 %v728_v43, %v727_v56  ;;  %v359_v3 = vsub.f32 %v594_v55, %v917_v5  ;;  %v281_v6 = vmax.f32 %v249_v60, 0.0  ;;  %v265_v7 = vmax.f32 %v233_v61, 0.0 }
  0x32   : > { %455 = vxpose.xlu1.b32.cont [2/16] (narrow) %v407_v34, 8  ;;  %v601_v4 = vor.u32 %v600_v52, %v599_v59  ;;  %v282_v9 = vmax.f32 %v250_v38, 0.0  ;;  %v266_v10 = vmax.f32 %v234_v2, 0.0  ;;  %v251_v11 = vadd.f32 %v917_v5, %v218_v62 }
  0x33   : > { %423 = vxpose.xlu0.b32.cont [2/16] (narrow) %v391_v46, 8  ;;  %v730_v8 = vsel %vm1003_vm6, %v729_v63, %v312_v25  ;;  %v313_v12 = vmin.f32 %v281_v6, 255.0  ;;  %v297_v13 = vmin.f32 %v265_v7, 255.0  ;;  %v408_v15 = vmul.f32 %v940_v33, %v375_v41 }
  0x34   : > { %v376_v16 = vsub.f32 %v730_v8, %v917_v5  ;;  %v602_v17 = vsel %vm1020_vm7, %v601_v4, %v985_v28  ;;  %v1036_v18 = vmin.f32 %v282_v9, 255.0  ;;  %v392_v19 = vmul.f32 %v940_v33, %v359_v3  ;;  %v170_v3 = vld [vmem:[%s907_s21 + $0x38] sm:$0xff]  ;;  %v187_v8 = vld [vmem:[%s907_s21 + $0xc0] sm:$0xff] }
  0x35   : > { %v731_v20 = vand.u32 2147483647, %v313_v12  ;;  %v733_v21 = vcvt.f32.s32 %v313_v12  ;;  %v1039_v22 = vmin.f32 %v266_v10, 255.0  ;;  %v603_v23 = vand.u32 2147483647, %v297_v13  ;;  %v171_v9 = vld [vmem:[%s907_s21 + $0x40] sm:$0xff] }
  0x36   : > { %v605_v24 = vcvt.f32.s32 %v297_v13  ;;  %v283_v25 = vmax.f32 %v251_v11, 0.0  ;;  %v202_v26 = vmul.f32 %v911_v0, %v169_v14  ;;  %v360_v27 = vsub.f32 %v602_v17, %v917_v5 }
  0x37   : > { %v734_v29 = vcvt.s32.f32 %v733_v21  ;;  %v736_v30 = vand.u32 2147483648, %v313_v12  ;;  %v741_v31 = vcvt.f32.s32 %v1036_v18  ;;  %v409_v28 = vmul.f32 %v940_v33, %v376_v16 }
  0x38   : > { %vm1045_vm8 = vcmp.lt.f32.partialorder %v731_v20, 8388608.0  ;;  %v606_v34 = vcvt.s32.f32 %v605_v24  ;;  %v608_v35 = vand.u32 2147483648, %v297_v13  ;;  %v739_v39 = vand.u32 2147483647, %v1036_v18  ;;  %v172_v20 = vld [vmem:[%s907_s21 + $0x48] sm:$0xff] }
  0x39   : > { %v735_v36 = vand.u32 2147483647, %v734_v29  ;;  %v742_v40 = vcvt.s32.f32 %v741_v31  ;;  %v613_v41 = vcvt.f32.s32 %v1039_v22  ;;  %vm1051_vm9 = vcmp.lt.f32.partialorder %v603_v23, 8388608.0 }
  0x3a   : > { %456 = vxpose.xlu1.b32.cont [3/16] (narrow) %v408_v15, 8  ;;  %v607_v43 = vand.u32 2147483647, %v606_v34  ;;  %v744_v44 = vand.u32 2147483648, %v1036_v18  ;;  %v1056_v37 = vmin.f32 %v283_v25, 255.0  ;;  %v235_v48 = vadd.f32 %v917_v5, %v202_v26 }
  0x3b   : > { %424 = vxpose.xlu0.b32.cont [3/16] (narrow) %v392_v19, 8  ;;  %v737_v45 = vor.u32 %v736_v30, %v735_v36  ;;  %v743_v46 = vand.u32 2147483647, %v742_v40  ;;  %v614_v47 = vcvt.s32.f32 %v613_v41  ;;  %v393_v49 = vmul.f32 %v940_v33, %v360_v27  ;;  %v188_v19 = vld [vmem:[%s907_s21 + $0xc8] sm:$0xff] }
  0x3c   : > { %v609_v50 = vor.u32 %v608_v35, %v607_v43  ;;  %v616_v51 = vand.u32 2147483648, %v1039_v22  ;;  %v749_v52 = vcvt.f32.s32 %v1056_v37  ;;  %v611_v54 = vand.u32 2147483647, %v1039_v22 }
  0x3d   : > { %v738_v53 = vsel %vm1045_vm8, %v737_v45, %v313_v12  ;;  %v615_v55 = vand.u32 2147483647, %v614_v47  ;;  %v267_v56 = vmax.f32 %v235_v48, 0.0  ;;  %v745_v60 = vor.u32 %v744_v44, %v743_v46 }
  0x3e   : > { %v377_v58 = vsub.f32 %v738_v53, %v917_v5  ;;  %v610_v59 = vsel %vm1051_vm9, %v609_v50, %v297_v13  ;;  %v750_v61 = vcvt.s32.f32 %v749_v52  ;;  %vm1070_vm10 = vcmp.lt.f32.partialorder %v739_v39, 8388608.0 }
  0x3f   : > { %v361_v62 = vsub.f32 %v610_v59, %v917_v5  ;;  %v1074_v1 = vmin.f32 %v267_v56, 255.0  ;;  %v617_v38 = vor.u32 %v616_v51, %v615_v55  ;;  %v219_v2 = vmul.f32 %v911_v0, %v186_v57 }
  0x40   : > { %vm1078_vm11 = vcmp.lt.f32.partialorder %v611_v54, 8388608.0  ;;  %v747_v6 = vand.u32 2147483647, %v1056_v37  ;;  %v410_v10 = vmul.f32 %v940_v33, %v377_v58  ;;  %v746_v11 = vsel %vm1070_vm10, %v745_v60, %v1036_v18 }
  0x41   : > { %v621_v7 = vcvt.f32.s32 %v1074_v1  ;;  %v751_v12 = vand.u32 2147483647, %v750_v61  ;;  %v752_v13 = vand.u32 2147483648, %v1056_v37  ;;  %v394_v14 = vmul.f32 %v940_v33, %v361_v62 }
  0x42   : > { %457 = vxpose.xlu1.b32.cont [4/16] (narrow) %v409_v28, 8  ;;  %v252_v16 = vadd.f32 %v917_v5, %v219_v2  ;;  %v203_v17 = vmul.f32 %v911_v0, %v170_v3  ;;  %v618_v21 = vsel %vm1078_vm11, %v617_v38, %v1039_v22  ;;  %v624_v23 = vand.u32 2147483648, %v1074_v1 }
  0x43   : > { %425 = vxpose.xlu0.b32.cont [4/16] (narrow) %v393_v49, 8  ;;  %v622_v15 = vcvt.s32.f32 %v621_v7  ;;  %v220_v18 = vmul.f32 %v911_v0, %v187_v8  ;;  %v204_v24 = vmul.f32 %v911_v0, %v171_v9  ;;  %v619_v25 = vand.u32 2147483647, %v1074_v1  ;;  %v189_v9 = vld [vmem:[%s907_s21 + $0xd0] sm:$0xff] }
  0x44   : > { %v284_v27 = vmax.f32 %v252_v16, 0.0  ;;  %v236_v29 = vadd.f32 %v917_v5, %v203_v17  ;;  %v221_v28 = vmul.f32 %v911_v0, %v188_v19  ;;  %v205_v22 = vmul.f32 %v911_v0, %v172_v20 }
  0x45   : > { %v623_v26 = vand.u32 2147483647, %v622_v15  ;;  %v253_v30 = vadd.f32 %v917_v5, %v220_v18  ;;  %v237_v31 = vadd.f32 %v917_v5, %v204_v24  ;;  %v378_v32 = vsub.f32 %v746_v11, %v917_v5 }
  0x46   : > { %v753_v34 = vor.u32 %v752_v13, %v751_v12  ;;  %v1109_v35 = vmin.f32 %v284_v27, 255.0  ;;  %v268_v36 = vmax.f32 %v236_v29, 0.0  ;;  %v254_v42 = vadd.f32 %v917_v5, %v221_v28  ;;  %v173_v27 = vld [vmem:[%s907_s21 + $0x50] sm:$0xff]  ;;  %v190_v29 = vld [vmem:[%s907_s21 + $0xd8] sm:$0xff] }
  0x47   : > { %v625_v39 = vor.u32 %v624_v23, %v623_v26  ;;  %v285_v40 = vmax.f32 %v253_v30, 0.0  ;;  %v269_v41 = vmax.f32 %v237_v31, 0.0  ;;  %v362_v43 = vsub.f32 %v618_v21, %v917_v5 }
  0x48   : > { %vm1113_vm12 = vcmp.lt.f32.partialorder %v747_v6, 8388608.0  ;;  %vm1117_vm13 = vcmp.lt.f32.partialorder %v619_v25, 8388608.0  ;;  %v757_v46 = vcvt.f32.s32 %v1109_v35  ;;  %v1122_v47 = vmin.f32 %v268_v36, 255.0 }
  0x49   : > { %v1124_v48 = vmin.f32 %v285_v40, 255.0  ;;  %v1126_v49 = vmin.f32 %v269_v41, 255.0  ;;  %v238_v50 = vadd.f32 %v917_v5, %v205_v22  ;;  %v411_v51 = vmul.f32 %v940_v33, %v378_v32  ;;  %v174_v32 = vld [vmem:[%s907_s21 + $0x58] sm:$0xff] }
  0x4a   : > { %458 = vxpose.xlu1.b32.cont [5/16] (narrow) %v410_v10, 8  ;;  %v758_v52 = vcvt.s32.f32 %v757_v46  ;;  %v754_v53 = vsel %vm1113_vm12, %v753_v34, %v1056_v37  ;;  %v626_v54 = vsel %vm1117_vm13, %v625_v39, %v1074_v1  ;;  %v629_v55 = vcvt.f32.s32 %v1122_v47 }
  0x4b   : > { %426 = vxpose.xlu0.b32.cont [5/16] (narrow) %v394_v14, 8  ;;  %v286_v56 = vmax.f32 %v254_v42, 0.0  ;;  %v755_v57 = vand.u32 2147483647, %v1109_v35  ;;  %v760_v59 = vand.u32 2147483648, %v1109_v35  ;;  %v765_v60 = vcvt.f32.s32 %v1124_v48 }
  0x4c   : > { %v759_v58 = vand.u32 2147483647, %v758_v52  ;;  %v395_v61 = vmul.f32 %v940_v33, %v362_v43  ;;  %v630_v62 = vcvt.s32.f32 %v629_v55  ;;  %v637_v37 = vcvt.f32.s32 %v1126_v49 }
  0x4d   : > { %v270_v63 = vmax.f32 %v238_v50, 0.0  ;;  %v379_v38 = vsub.f32 %v754_v53, %v917_v5  ;;  %v363_v1 = vsub.f32 %v626_v54, %v917_v5  ;;  %v632_v2 = vand.u32 2147483648, %v1122_v47 }
  0x4e   : > { %v766_v3 = vcvt.s32.f32 %v765_v60  ;;  %v627_v4 = vand.u32 2147483647, %v1122_v47  ;;  %v631_v6 = vand.u32 2147483647, %v630_v62  ;;  %v638_v7 = vcvt.s32.f32 %v637_v37 }
  0x4f   : > { %v1146_v8 = vmin.f32 %v286_v56, 255.0  ;;  %vm1149_vm14 = vcmp.lt.f32.partialorder %v755_v57, 8388608.0  ;;  %v761_v11 = vor.u32 %v760_v59, %v759_v58  ;;  %v763_v12 = vand.u32 2147483647, %v1124_v48 }
  0x50   : > { %v635_v13 = vand.u32 2147483647, %v1126_v49  ;;  %v767_v14 = vand.u32 2147483647, %v766_v3  ;;  %v768_v15 = vand.u32 2147483648, %v1124_v48  ;;  %v640_v16 = vand.u32 2147483648, %v1126_v49 }
  0x51   : > { %v1157_v17 = vmin.f32 %v270_v63, 255.0  ;;  %v633_v19 = vor.u32 %v632_v2, %v631_v6  ;;  %v639_v20 = vand.u32 2147483647, %v638_v7  ;;  %v773_v21 = vcvt.f32.s32 %v1146_v8 }
  0x52   : > { %459 = vxpose.xlu1.b32.cont [6/16] (narrow) %v411_v51, 8  ;;  %v222_v23 = vmul.f32 %v911_v0, %v189_v9  ;;  %vm1161_vm15 = vcmp.lt.f32.partialorder %v627_v4, 8388608.0  ;;  %v412_v24 = vmul.f32 %v940_v33, %v379_v38  ;;  %v396_v25 = vmul.f32 %v940_v33, %v363_v1  ;;  %v175_v1 = vld [vmem:[%s907_s21 + $0x60] sm:$0xff] }
  0x53   : > { %427 = vxpose.xlu0.b32.cont [6/16] (narrow) %v395_v61, 8  ;;  %v762_v26 = vsel %vm1149_vm14, %v761_v11, %v1109_v35  ;;  %vm1172_vm0 = vcmp.lt.f32.partialorder %v763_v12, 8388608.0  ;;  %v769_v31 = vor.u32 %v768_v15, %v767_v14  ;;  %vm1176_vm1 = vcmp.lt.f32.partialorder %v635_v13, 8388608.0 }
  0x54   : > { %v645_v22 = vcvt.f32.s32 %v1157_v17  ;;  %v634_v34 = vsel %vm1161_vm15, %v633_v19, %v1122_v47  ;;  %v641_v36 = vor.u32 %v640_v16, %v639_v20  ;;  %v774_v35 = vcvt.s32.f32 %v773_v21  ;;  %v192_v20 = vld [vmem:[%s907_s21 + $0xe8] sm:$0xff] }
  0x55   : > { %v255_v39 = vadd.f32 %v917_v5, %v222_v23  ;;  %v380_v40 = vsub.f32 %v762_v26, %v917_v5  ;;  %v206_v42 = vmul.f32 %v911_v0, %v173_v27  ;;  %v223_v43 = vmul.f32 %v911_v0, %v190_v29 }
  0x56   : > { %v646_v41 = vcvt.s32.f32 %v645_v22  ;;  %v771_v44 = vand.u32 2147483647, %v1146_v8  ;;  %v776_v45 = vand.u32 2147483648, %v1146_v8  ;;  %v207_v47 = vmul.f32 %v911_v0, %v174_v32 }
  0x57   : > { %v287_v46 = vmax.f32 %v255_v39, 0.0  ;;  %v364_v50 = vsub.f32 %v634_v34, %v917_v5  ;;  %v770_v51 = vsel %vm1172_vm0, %v769_v31, %v1124_v48  ;;  %v239_v52 = vadd.f32 %v917_v5, %v206_v42  ;;  %v191_v48 = vld [vmem:[%s907_s21 + $0xe0] sm:$0xff] }
  0x58   : > { %v256_v53 = vadd.f32 %v917_v5, %v223_v43  ;;  %v642_v54 = vsel %vm1176_vm1, %v641_v36, %v1126_v49  ;;  %v775_v55 = vand.u32 2147483647, %v774_v35  ;;  %v240_v57 = vadd.f32 %v917_v5, %v207_v47 }
  0x59   : > { %v1201_v56 = vmin.f32 %v287_v46, 255.0  ;;  %v647_v58 = vand.u32 2147483647, %v646_v41  ;;  %v648_v59 = vand.u32 2147483648, %v1157_v17  ;;  %v271_v60 = vmax.f32 %v239_v52, 0.0 }
  0x5a   : > { %460 = vxpose.xlu1.b32.cont [7/16] (narrow) %v412_v24, 8  ;;  %v288_v61 = vmax.f32 %v256_v53, 0.0  ;;  %v413_v62 = vmul.f32 %v940_v33, %v380_v40  ;;  %v643_v37 = vand.u32 2147483647, %v1157_v17  ;;  %v272_v38 = vmax.f32 %v240_v57, 0.0  ;;  %v176_v40 = vld [vmem:[%s907_s21 + $0x68] sm:$0xff] }
  0x5b   : > { %428 = vxpose.xlu0.b32.cont [7/16] (narrow) %v396_v25, 8  ;;  %v781_v63 = vcvt.f32.s32 %v1201_v56  ;;  %v397_v49 = vmul.f32 %v940_v33, %v364_v50  ;;  %vm1211_vm2 = vcmp.lt.f32.partialorder %v771_v44, 8388608.0  ;;  %v1215_v3 = vmin.f32 %v271_v60, 255.0  ;;  %v193_v57 = vld [vmem:[%s907_s21 + $0xf0] sm:$0xff] }
  0x5c   : > { %v381_v4 = vsub.f32 %v770_v51, %v917_v5  ;;  %v365_v6 = vsub.f32 %v642_v54, %v917_v5  ;;  %v777_v7 = vor.u32 %v776_v45, %v775_v55  ;;  %v224_v9 = vmul.f32 %v911_v0, %v191_v48 }
  0x5d   : > { %v649_v10 = vor.u32 %v648_v59, %v647_v58  ;;  %v653_v11 = vcvt.f32.s32 %v1215_v3  ;;  %v1221_v12 = vmin.f32 %v288_v61, 255.0  ;;  %v208_v13 = vmul.f32 %v911_v0, %v175_v1 }
  0x5e   : > { %vm1224_vm3 = vcmp.lt.f32.partialorder %v643_v37, 8388608.0  ;;  %v782_v15 = vcvt.s32.f32 %v781_v63  ;;  %v1228_v16 = vmin.f32 %v272_v38, 255.0  ;;  %v414_v21 = vmul.f32 %v940_v33, %v381_v4  ;;  %v177_v38 = vld [vmem:[%s907_s21 + $0x70] sm:$0xff] }
  0x5f   : > { %v654_v19 = vcvt.s32.f32 %v653_v11  ;;  %v398_v23 = vmul.f32 %v940_v33, %v365_v6  ;;  %v778_v18 = vsel %vm1211_vm2, %v777_v7, %v1146_v8  ;;  %v779_v24 = vand.u32 2147483647, %v1201_v56 }
  0x60   : > { %v650_v25 = vsel %vm1224_vm3, %v649_v10, %v1157_v17  ;;  %v789_v26 = vcvt.f32.s32 %v1221_v12  ;;  %v257_v27 = vadd.f32 %v917_v5, %v224_v9  ;;  %v241_v29 = vadd.f32 %v917_v5, %v208_v13 }
  0x61   : > { %v783_v30 = vand.u32 2147483647, %v782_v15  ;;  %v784_v31 = vand.u32 2147483648, %v1201_v56  ;;  %v661_v28 = vcvt.f32.s32 %v1228_v16  ;;  %v225_v8 = vmul.f32 %v911_v0, %v192_v20 }
  0x62   : > { %461 = vxpose.xlu1.b32.cont [8/16] (narrow) %v413_v62, 8  ;;  %v655_v22 = vand.u32 2147483647, %v654_v19  ;;  %v656_v32 = vand.u32 2147483648, %v1215_v3  ;;  %v289_v34 = vmax.f32 %v257_v27, 0.0  ;;  %v273_v36 = vmax.f32 %v241_v29, 0.0 }
  0x63   : > { %429 = vxpose.xlu0.b32.cont [8/16] (narrow) %v397_v49, 8  ;;  %v382_v17 = vsub.f32 %v778_v18, %v917_v5  ;;  %v366_v35 = vsub.f32 %v650_v25, %v917_v5  ;;  %v651_v39 = vand.u32 2147483647, %v1215_v3  ;;  %v790_v41 = vcvt.s32.f32 %v789_v26  ;;  %v194_v18 = vld [vmem:[%s907_s21 + $0xf8] sm:$0xff] }
  0x64   : > { %v785_v42 = vor.u32 %v784_v31, %v783_v30  ;;  %v662_v43 = vcvt.s32.f32 %v661_v28  ;;  %v1251_v44 = vmin.f32 %v289_v34, 255.0  ;;  %v258_v45 = vadd.f32 %v917_v5, %v225_v8 }
  0x65   : > { %vm1254_vm4 = vcmp.lt.f32.partialorder %v779_v24, 8388608.0  ;;  %v657_v47 = vor.u32 %v656_v32, %v655_v22  ;;  %v1258_v50 = vmin.f32 %v273_v36, 255.0  ;;  %v209_v51 = vmul.f32 %v911_v0, %v176_v40 }
  0x66   : > { %v415_v52 = vmul.f32 %v940_v33, %v382_v17  ;;  %v399_v53 = vmul.f32 %v940_v33, %v366_v35  ;;  %vm1263_vm5 = vcmp.lt.f32.partialorder %v651_v39, 8388608.0  ;;  %v787_v55 = vand.u32 2147483647, %v1221_v12  ;;  %v178_v35 = vld [vmem:[%s907_s21 + $0x78] sm:$0xff] }
  0x67   : > { %v791_v58 = vand.u32 2147483647, %v790_v41  ;;  %v792_v59 = vand.u32 2147483648, %v1221_v12  ;;  %v659_v60 = vand.u32 2147483647, %v1228_v16  ;;  %v664_v61 = vand.u32 2147483648, %v1228_v16 }
  0x68   : > { %v786_v48 = vsel %vm1254_vm4, %v785_v42, %v1201_v56  ;;  %v663_v62 = vand.u32 2147483647, %v662_v43  ;;  %v797_v37 = vcvt.f32.s32 %v1251_v44  ;;  %v290_v63 = vmax.f32 %v258_v45, 0.0 }
  0x69   : > { %v658_v1 = vsel %vm1263_vm5, %v657_v47, %v1215_v3  ;;  %v669_v49 = vcvt.f32.s32 %v1258_v50  ;;  %v242_v2 = vadd.f32 %v917_v5, %v209_v51  ;;  %v226_v4 = vmul.f32 %v911_v0, %v193_v57 }
  0x6a   : > { %462 = vxpose.xlu1.b32.cont [9/16] (narrow) %v414_v21, 8  ;;  %vm1283_vm6 = vcmp.lt.f32.partialorder %v787_v55, 8388608.0  ;;  %v383_v56 = vsub.f32 %v786_v48, %v917_v5  ;;  %v793_v7 = vor.u32 %v792_v59, %v791_v58  ;;  %v210_v10 = vmul.f32 %v911_v0, %v177_v38 }
  0x6b   : > { %430 = vxpose.xlu0.b32.cont [9/16] (narrow) %v398_v23, 8  ;;  %v274_v9 = vmax.f32 %v242_v2, 0.0  ;;  %v367_v3 = vsub.f32 %v658_v1, %v917_v5  ;;  %v665_v11 = vor.u32 %v664_v61, %v663_v62  ;;  %v798_v13 = vcvt.s32.f32 %v797_v37 }
  0x6c   : > { %v1290_v14 = vmin.f32 %v290_v63, 255.0  ;;  %vm1292_vm7 = vcmp.lt.f32.partialorder %v659_v60, 8388608.0  ;;  %v670_v19 = vcvt.s32.f32 %v669_v49  ;;  %v259_v20 = vadd.f32 %v917_v5, %v226_v4 }
  0x6d   : > { %v1297_v21 = vmin.f32 %v274_v9, 255.0  ;;  %v243_v23 = vadd.f32 %v917_v5, %v210_v10  ;;  %v416_v24 = vmul.f32 %v940_v33, %v383_v56  ;;  %v794_v25 = vsel %vm1283_vm6, %v793_v7, %v1221_v12 }
  0x6e   : > { %v795_v26 = vand.u32 2147483647, %v1251_v44  ;;  %v800_v27 = vand.u32 2147483648, %v1251_v44  ;;  %v400_v29 = vmul.f32 %v940_v33, %v367_v3  ;;  %v666_v30 = vsel %vm1292_vm7, %v665_v11, %v1228_v16 }
  0x6f   : > { %v799_v31 = vand.u32 2147483647, %v798_v13  ;;  %v805_v28 = vcvt.f32.s32 %v1290_v14  ;;  %v671_v8 = vand.u32 2147483647, %v670_v19  ;;  %v672_v22 = vand.u32 2147483648, %v1258_v50 }
  0x70   : > { %v291_v32 = vmax.f32 %v259_v20, 0.0  ;;  %v227_v34 = vmul.f32 %v911_v0, %v194_v18  ;;  %v667_v12 = vand.u32 2147483647, %v1258_v50  ;;  %v677_v36 = vcvt.f32.s32 %v1297_v21 }
  0x71   : > { %v275_v17 = vmax.f32 %v243_v23, 0.0  ;;  %v384_v39 = vsub.f32 %v794_v25, %v917_v5  ;;  %v368_v40 = vsub.f32 %v666_v30, %v917_v5  ;;  %vm1319_vm8 = vcmp.lt.f32.partialorder %v795_v26, 8388608.0 }
  0x72   : > { %463 = vxpose.xlu1.b32.cont [10/16] (narrow) %v415_v52, 8  ;;  %v801_v41 = vor.u32 %v800_v27, %v799_v31  ;;  %v806_v42 = vcvt.s32.f32 %v805_v28  ;;  %v673_v43 = vor.u32 %v672_v22, %v671_v8  ;;  %v1323_v45 = vmin.f32 %v291_v32, 255.0 }
  0x73   : > { %431 = vxpose.xlu0.b32.cont [10/16] (narrow) %v399_v53, 8  ;;  %v260_v46 = vadd.f32 %v917_v5, %v227_v34  ;;  %v211_v47 = vmul.f32 %v911_v0, %v178_v35  ;;  %vm1327_vm9 = vcmp.lt.f32.partialorder %v667_v12, 8388608.0  ;;  %v678_v52 = vcvt.s32.f32 %v677_v36 }
  0x74   : > { %v1331_v53 = vmin.f32 %v275_v17, 255.0  ;;  %v417_v54 = vmul.f32 %v940_v33, %v384_v39  ;;  %v401_v55 = vmul.f32 %v940_v33, %v368_v40  ;;  %v802_v57 = vsel %vm1319_vm8, %v801_v41, %v1251_v44 }
  0x75   : > { %v803_v58 = vand.u32 2147483647, %v1290_v14  ;;  %v807_v59 = vand.u32 2147483647, %v806_v42  ;;  %v808_v0 = vand.u32 2147483648, %v1290_v14  ;;  %v674_v60 = vsel %vm1327_vm9, %v673_v43, %v1258_v50 }
  0x76   : > { %v813_v61 = vcvt.f32.s32 %v1323_v45  ;;  %v292_v48 = vmax.f32 %v260_v46, 0.0  ;;  %v244_v62 = vadd.f32 %v917_v5, %v211_v47  ;;  %v679_v37 = vand.u32 2147483647, %v678_v52 }
  0x77   : > { %v680_v63 = vand.u32 2147483648, %v1297_v21  ;;  %v685_v38 = vcvt.f32.s32 %v1331_v53  ;;  %v675_v44 = vand.u32 2147483647, %v1297_v21  ;;  %v385_v49 = vsub.f32 %v802_v57, %v917_v5 }
  0x78   : > { %v276_v1 = vmax.f32 %v244_v62, 0.0  ;;  %v369_v2 = vsub.f32 %v674_v60, %v917_v5  ;;  %v809_v4 = vor.u32 %v808_v0, %v807_v59  ;;  %vm1350_vm10 = vcmp.lt.f32.partialorder %v803_v58, 8388608.0 }
  0x79   : > { %v814_v6 = vcvt.s32.f32 %v813_v61  ;;  %v324_v56 = vmin.f32 %v292_v48, 255.0  ;;  %v681_v7 = vor.u32 %v680_v63, %v679_v37  ;;  %v686_v9 = vcvt.s32.f32 %v685_v38 }
  0x7a   : > { %464 = vxpose.xlu1.b32.cont [11/16] (narrow) %v416_v24, 8  ;;  %v308_v10 = vmin.f32 %v276_v1, 255.0  ;;  %vm1354_vm11 = vcmp.lt.f32.partialorder %v675_v44, 8388608.0  ;;  %v418_v11 = vmul.f32 %v940_v33, %v385_v49  ;;  %v402_v13 = vmul.f32 %v940_v33, %v369_v2 }
  0x7b   : > { %432 = vxpose.xlu0.b32.cont [11/16] (narrow) %v400_v29, 8  ;;  %v810_v15 = vsel %vm1350_vm10, %v809_v4, %v1290_v14  ;;  %v811_v19 = vand.u32 2147483647, %v1323_v45  ;;  %v815_v20 = vand.u32 2147483647, %v814_v6  ;;  %v816_v23 = vand.u32 2147483648, %v1323_v45 }
  0x7c   : > { %v821_v18 = vcvt.f32.s32 %v324_v56  ;;  %v682_v24 = vsel %vm1354_vm11, %v681_v7, %v1297_v21  ;;  %v687_v25 = vand.u32 2147483647, %v686_v9  ;;  %v688_v26 = vand.u32 2147483648, %v1331_v53 }
  0x7d   : > { %v693_v27 = vcvt.f32.s32 %v308_v10  ;;  %v683_v29 = vand.u32 2147483647, %v1331_v53  ;;  %v386_v30 = vsub.f32 %v810_v15, %v917_v5  ;;  %v370_v14 = vsub.f32 %v682_v24, %v917_v5 }
  0x7e   : > { %v817_v31 = vor.u32 %v816_v23, %v815_v20  ;;  %v822_v28 = vcvt.s32.f32 %v821_v18  ;;  %vm812_vm12 = vcmp.lt.f32.partialorder %v811_v19, 8388608.0  ;;  %v689_v8 = vor.u32 %v688_v26, %v687_v25 }
  0x7f   : > { %v694_v22 = vcvt.s32.f32 %v693_v27  ;;  %vm684_vm13 = vcmp.lt.f32.partialorder %v683_v29, 8388608.0  ;;  %v419_v21 = vmul.f32 %v940_v33, %v386_v30  ;;  %v403_v32 = vmul.f32 %v940_v33, %v370_v14 }
  0x80   : > { %v818_v34 = vsel %vm812_vm12, %v817_v31, %v1323_v45  ;;  %v823_v12 = vand.u32 2147483647, %v822_v28  ;;  %v824_v36 = vand.u32 2147483648, %v324_v56  ;;  %v690_v17 = vsel %vm684_vm13, %v689_v8, %v1331_v53 }
  0x81   : > { %v819_v35 = vand.u32 2147483647, %v324_v56  ;;  %v695_v39 = vand.u32 2147483647, %v694_v22  ;;  %v696_v40 = vand.u32 2147483648, %v308_v10  ;;  %v387_v41 = vsub.f32 %v818_v34, %v917_v5 }
  0x82   : > { %465 = vxpose.xlu1.b32.cont [12/16] (narrow) %v417_v54, 8  ;;  %v691_v16 = vand.u32 2147483647, %v308_v10  ;;  %v371_v42 = vsub.f32 %v690_v17, %v917_v5  ;;  %v825_v43 = vor.u32 %v824_v36, %v823_v12 }
  0x83   : > { %433 = vxpose.xlu0.b32.cont [12/16] (narrow) %v401_v55, 8  ;;  %vm820_vm14 = vcmp.lt.f32.partialorder %v819_v35, 8388608.0  ;;  %v697_v46 = vor.u32 %v696_v40, %v695_v39  ;;  %v420_v45 = vmul.f32 %v940_v33, %v387_v41 }
  0x84   : > { %vm692_vm15 = vcmp.lt.f32.partialorder %v691_v16, 8388608.0  ;;  %v404_v47 = vmul.f32 %v940_v33, %v371_v42  ;;  %v826_v51 = vsel %vm820_vm14, %v825_v43, %v324_v56 }
  0x85   : > { %v698_v52 = vsel %vm692_vm15, %v697_v46, %v308_v10  ;;  %v388_v53 = vsub.f32 %v826_v51, %v917_v5 }
  0x86   : > { %v372_v54 = vsub.f32 %v698_v52, %v917_v5 }
  0x87   : > { %v421_v55 = vmul.f32 %v940_v33, %v388_v53 }
  0x88   : > { %v405_v57 = vmul.f32 %v940_v33, %v372_v54 }
  0x8a   : > { %466 = vxpose.xlu1.b32.cont [13/16] (narrow) %v418_v11, 8 }
  0x8b   : > { %434 = vxpose.xlu0.b32.cont [13/16] (narrow) %v402_v13, 8 }
  0x92   : > { %467 = vxpose.xlu1.b32.cont [14/16] (narrow) %v419_v21, 8 }
  0x93   : > { %435 = vxpose.xlu0.b32.cont [14/16] (narrow) %v403_v32, 8 }
  0x9a   : > { %468 = vxpose.xlu1.b32.cont [15/16] (narrow) %v420_v45, 8 }
  0x9b   : > { %436 = vxpose.xlu0.b32.cont [15/16] (narrow) %v404_v47, 8 }
  0xa2   : > { %469 = vxpose.xlu1.b32.end [16/16] (narrow) %v421_v55, 8 }
  0xa3   : > { %437 = vxpose.xlu0.b32.end [16/16] (narrow) %v405_v57, 8 }
  0xce   : > { %v470_v58 = vpop.trf.xlu1 }
  0xcf   : > { %487 = vst [vmem:[%s159_s26 + $0x8] sm:$0xff] %v470_v58  ;;  %v438_v59 = vpop.trf.xlu0 }
  0xd0   : > { %486 = vst [vmem:[%s159_s26] sm:$0xff] %v438_v59 }
  0xd1 PF: > { %s13_s9 = sadd.s32 1, %s871_s9  }
  0xd2   : > { %p10_p8 = scmp.ge.s32.totalorder %s13_s9, 4  }
  0xd4   :  { %12 = sbr.rel (!%p10_p8) target bundleno = 1 (0x1), region = 63 }
  0xd9   :  { %509 = vsyncpa [#allocation3], 1 }
  0xda   :  { %511 = vsyncpa [#allocation3 + $0x1], 1 }

</bundles_post_ra>
